<compile_context>
chip_gen: v7x
topology: tpu7x:2x2x1
jax: 0.10.0
libtpu: 0.0.40
codegen_flags: <defaults>
</compile_context>

<pallas_src>
import functools

import numpy as np
import jax
import jax.numpy as jnp
from jax import lax
from jax.experimental import pallas as pl
from jax.experimental.pallas import tpu as pltpu

_LN_EPS = 1e-5
_SQRT_2_OVER_PI = 0.7978845608028654
_GELU_C = 0.044715


def _gelu_tanh(x):
    # tanh-approximate GELU: one EUP op + a handful of VALU ops.
    # (PyTorch nn.GELU() is the erf form; max deviation ~1e-3, well inside the
    #  test tolerance and much cheaper on the VALU-bound path.)
    return 0.5 * x * (1.0 + jnp.tanh(_SQRT_2_OVER_PI * (x + _GELU_C * x * x * x)))


# ----------------------------------------------------------------------------
# Fused kernel: one grid step == (one batch element, one MixerBlock).
# The activation is carried across the block axis in an f32 VMEM scratch.
# ----------------------------------------------------------------------------
def _mixer_block_kernel(x_ref, gamma_ref, beta_ref,
                        w1pt_ref, b1p_ref, w2pt_ref, b2p_ref,
                        w1c_ref, b1c_ref, w2c_ref, b2c_ref,
                        o_ref, acc_ref):
    blk = pl.program_id(1)

    # First block of this batch element: load the input into the carry.
    @pl.when(blk == 0)
    def _():
        acc_ref[...] = x_ref[0]

    x = acc_ref[...]                      # (S, C) float32 running activation
    g = gamma_ref[0]                      # (1, C)
    b = beta_ref[0]                       # (1, C)

    def layer_norm(v):                    # LayerNorm over channels (f32)
        mu = jnp.mean(v, axis=-1, keepdims=True)
        d = v - mu
        var = jnp.mean(d * d, axis=-1, keepdims=True)
        return d * lax.rsqrt(var + _LN_EPS) * g + b

    bf16 = jnp.bfloat16

    # --- token (patches) mixing MLP: Mlp(LayerNorm(x).mT) --------------------
    # Expressed as left-multiplication by pre-transposed bf16 weights so the
    # activation never needs an in-kernel transpose; accumulation stays f32.
    l1 = layer_norm(x)                                        # (S, C) f32
    h1 = _gelu_tanh(jnp.dot(w1pt_ref[0], l1.astype(bf16),
                            preferred_element_type=jnp.float32)
                    + b1p_ref[0])                             # (ES, C) f32
    out_pt = (jnp.dot(w2pt_ref[0], h1.astype(bf16),
                      preferred_element_type=jnp.float32)
              + b2p_ref[0])                                   # (S, C) == out.mT
    u = out_pt + x                                            # out.mT + x

    # --- channel mixing MLP (same LayerNorm params, per the module) ----------
    l2 = layer_norm(u)
    h2 = _gelu_tanh(jnp.dot(l2.astype(bf16), w1c_ref[0],
                            preferred_element_type=jnp.float32)
                    + b1c_ref[0])                             # (S, EC) f32
    out_c = (jnp.dot(h2.astype(bf16), w2c_ref[0],
                     preferred_element_type=jnp.float32)
             + b2c_ref[0])                                    # (S, C) f32
    y = out_c + u                                             # second residual

    acc_ref[...] = y                       # carry to the next mixer block
    o_ref[0] = y.astype(o_ref.dtype)       # cheap VMEM store; HBM writeback
                                            # only happens when b advances


def mlp_mixer_pallas(x, packed):
    """x: (B, S, C) float32; packed: dict of block-stacked parameter arrays."""
    B, S, C = x.shape
    nb = packed["gamma"].shape[0]
    ES = packed["w1pt"].shape[1]           # exp * S
    EC = packed["w1c"].shape[2]            # exp * C

    def wspec(a):                          # per-block parameter tile
        return pl.BlockSpec((1,) + a.shape[1:], lambda b, k: (k, 0, 0))

    cost = pl.CostEstimate(
        flops=int(2 * B * nb * (2 * ES * S * C + 2 * S * EC * C)),
        transcendentals=int(B * nb * (ES * C + S * EC)),
        bytes_accessed=int(2 * B * S * C * 4                      # x in + out
                           + B * nb * 2 * (2 * ES * S + 2 * C * EC)  # bf16 W
                           + B * nb * 4 * (ES * C + S * C + EC + 3 * C)))

    return pl.pallas_call(
        _mixer_block_kernel,
        out_shape=jax.ShapeDtypeStruct((B, S, C), jnp.float32),
        grid_spec=pltpu.PrefetchScalarGridSpec(
            num_scalar_prefetch=0,
            grid=(B, nb),
            in_specs=[pl.BlockSpec((1, S, C), lambda b, k: (b, 0, 0)),
                      wspec(packed["gamma"]), wspec(packed["beta"]),
                      wspec(packed["w1pt"]), wspec(packed["b1p"]),
                      wspec(packed["w2pt"]), wspec(packed["b2p"]),
                      wspec(packed["w1c"]), wspec(packed["b1c"]),
                      wspec(packed["w2c"]), wspec(packed["b2c"])],
            out_specs=pl.BlockSpec((1, S, C), lambda b, k: (b, 0, 0)),
            scratch_shapes=[pltpu.VMEM((S, C), jnp.float32)]),
        compiler_params=pltpu.CompilerParams(
            dimension_semantics=("parallel", "arbitrary")),
        cost_estimate=cost,
    )(x, packed["gamma"], packed["beta"],
      packed["w1pt"], packed["b1p"], packed["w2pt"], packed["b2p"],
      packed["w1c"], packed["b1c"], packed["w2c"], packed["b2c"])


# ----------------------------------------------------------------------------
# Pure-JAX reference (mirrors the PyTorch MixerBlock / MlpMixer forward,
# full f32, exact erf GELU).
# ----------------------------------------------------------------------------
def mlp_mixer_ref(x, blocks_params):
    mm = functools.partial(jnp.matmul, precision=lax.Precision.HIGHEST)
    gelu = lambda v: jax.nn.gelu(v, approximate=False)

    def layer_norm(v, g, b):
        mu = jnp.mean(v, axis=-1, keepdims=True)
        var = jnp.mean((v - mu) ** 2, axis=-1, keepdims=True)
        return (v - mu) / jnp.sqrt(var + _LN_EPS) * g + b

    y = x
    for p in blocks_params:
        l1 = layer_norm(y, p["gamma"], p["beta"])
        t = jnp.swapaxes(l1, -1, -2)                        # (B, C, S)
        h = gelu(mm(t, p["w1p"]) + p["b1p"])
        out_p = mm(h, p["w2p"]) + p["b2p"]                  # (B, C, S)
        u = jnp.swapaxes(out_p, -1, -2) + y                 # out.mT + x
        l2 = layer_norm(u, p["gamma"], p["beta"])
        h2 = gelu(mm(l2, p["w1c"]) + p["b1c"])
        out_c = mm(h2, p["w2c"]) + p["b2c"]
        y = out_c + u
    return y


# ----------------------------------------------------------------------------
# Deterministic parameter init (PyTorch Linear-style uniform init).
# ----------------------------------------------------------------------------
def init_params(key, S, C, exp, num_blocks):
    blocks_params = []
    for _ in range(num_blocks):
        key, k1, k2, k3, k4, k5, k6, k7, k8, k9, k10 = jax.random.split(key, 11)

        def lin(kw, kb, fan_in, fan_out):
            bound = 1.0 / np.sqrt(fan_in)
            w = jax.random.uniform(kw, (fan_in, fan_out), jnp.float32,
                                   -bound, bound)
            b = jax.random.uniform(kb, (fan_out,), jnp.float32, -bound, bound)
            return w, b

        w1p, b1p = lin(k1, k2, S, exp * S)          # token-mix layer 1
        w2p, b2p = lin(k3, k4, exp * S, S)          # token-mix layer 2
        w1c, b1c = lin(k5, k6, C, exp * C)          # channel-mix layer 1
        w2c, b2c = lin(k7, k8, exp * C, C)          # channel-mix layer 2
        gamma = 1.0 + 0.1 * jax.random.normal(k9, (C,), jnp.float32)
        beta = 0.1 * jax.random.normal(k10, (C,), jnp.float32)
        blocks_params.append(dict(w1p=w1p, b1p=b1p, w2p=w2p, b2p=b2p,
                                  w1c=w1c, b1c=b1c, w2c=w2c, b2c=b2c,
                                  gamma=gamma, beta=beta))
    return blocks_params


def pack_params(blocks_params):
    """Stack per-block params; bf16 weights, pre-transposed token-MLP weights,
    pre-broadcast token-MLP biases (avoids (*,1) lane-padded buffers)."""
    C = blocks_params[0]["gamma"].shape[0]
    bf16 = jnp.bfloat16
    st = lambda f: jnp.stack([f(p) for p in blocks_params])
    return {
        "gamma": st(lambda p: p["gamma"][None, :]),                    # (nb,1,C)  f32
        "beta":  st(lambda p: p["beta"][None, :]),                     # (nb,1,C)  f32
        "w1pt":  st(lambda p: p["w1p"].T.astype(bf16)),                # (nb,ES,S) bf16
        "b1p":   st(lambda p: jnp.broadcast_to(
            p["b1p"][:, None], (p["b1p"].shape[0], C))),               # (nb,ES,C) f32
        "w2pt":  st(lambda p: p["w2p"].T.astype(bf16)),                # (nb,S,ES) bf16
        "b2p":   st(lambda p: jnp.broadcast_to(
            p["b2p"][:, None], (p["b2p"].shape[0], C))),               # (nb,S,C)  f32
        "w1c":   st(lambda p: p["w1c"].astype(bf16)),                  # (nb,C,EC) bf16
        "b1c":   st(lambda p: p["b1c"][None, :]),                      # (nb,1,EC) f32
        "w2c":   st(lambda p: p["w2c"].astype(bf16)),                  # (nb,EC,C) bf16
        "b2c":   st(lambda p: p["b2c"][None, :]),                      # (nb,1,C)  f32
    }


if __name__ == "__main__":
    # batch=2, patches_dim (seq)=64, channels_dim (hidden)=32, exp=2, blocks=2
    B, S, C, EXP, NBLOCKS = 2, 64, 32, 2, 2
    key = jax.random.PRNGKey(0)
    kx, kp = jax.random.split(key)
    x = jax.random.normal(kx, (B, S, C), jnp.float32)

    blocks_params = init_params(kp, S, C, EXP, NBLOCKS)
    packed = pack_params(blocks_params)

    out = jax.block_until_ready(mlp_mixer_pallas(x, packed))
    assert out.shape == (B, S, C), out.shape

    ref = jax.block_until_ready(mlp_mixer_ref(x, blocks_params))
    # Kernel uses bf16 MXU operands + tanh-GELU; reference is f32 / exact erf.
    np.testing.assert_allclose(np.asarray(out), np.asarray(ref),
                               rtol=2e-2, atol=2e-2)
    print("KERNEL_OK")
</pallas_src>

<mosaic_0001>
module attributes {stable_mosaic.version = 11 : i64} {
  func.func @_mixer_block_kernel(%arg0: i32, %arg1: i32, %arg2: memref<1x64x32xf32, #tpu.memory_space<vmem>>, %arg3: memref<1x1x32xf32, #tpu.memory_space<vmem>>, %arg4: memref<1x1x32xf32, #tpu.memory_space<vmem>>, %arg5: memref<1x128x64xbf16, #tpu.memory_space<vmem>>, %arg6: memref<1x128x32xf32, #tpu.memory_space<vmem>>, %arg7: memref<1x64x128xbf16, #tpu.memory_space<vmem>>, %arg8: memref<1x64x32xf32, #tpu.memory_space<vmem>>, %arg9: memref<1x32x64xbf16, #tpu.memory_space<vmem>>, %arg10: memref<1x1x64xf32, #tpu.memory_space<vmem>>, %arg11: memref<1x64x32xbf16, #tpu.memory_space<vmem>>, %arg12: memref<1x1x32xf32, #tpu.memory_space<vmem>>, %arg13: memref<1x64x32xf32, #tpu.memory_space<vmem>>, %arg14: memref<64x32xf32, #tpu.memory_space<vmem>>) attributes {dimension_semantics = [#tpu.dimension_semantics<parallel>, #tpu.dimension_semantics<arbitrary>], iteration_bounds = array<i64: 2, 2>, scalar_prefetch = 0 : i64, scratch_operands = 1 : i64, tpu.core_type = #tpu.core_type<tc>, window_params = [{transform_indices = @transform_0, window_bounds = array<i64: 1, 64, 32>}, {transform_indices = @transform_1, window_bounds = array<i64: 1, 1, 32>}, {transform_indices = @transform_2, window_bounds = array<i64: 1, 1, 32>}, {transform_indices = @transform_3, window_bounds = array<i64: 1, 128, 64>}, {transform_indices = @transform_4, window_bounds = array<i64: 1, 128, 32>}, {transform_indices = @transform_5, window_bounds = array<i64: 1, 64, 128>}, {transform_indices = @transform_6, window_bounds = array<i64: 1, 64, 32>}, {transform_indices = @transform_7, window_bounds = array<i64: 1, 32, 64>}, {transform_indices = @transform_8, window_bounds = array<i64: 1, 1, 64>}, {transform_indices = @transform_9, window_bounds = array<i64: 1, 64, 32>}, {transform_indices = @transform_10, window_bounds = array<i64: 1, 1, 32>}, {transform_indices = @transform_11, window_bounds = array<i64: 1, 64, 32>}]} {
    %c0_i32 = arith.constant 0 : i32
    %0 = arith.cmpi eq, %arg1, %c0_i32 : i32
    %1 = arith.extui %0 : i1 to i32
    %c0_i32_0 = arith.constant 0 : i32
    %2 = arith.cmpi ne, %1, %c0_i32_0 : i32
    scf.if %2 {
      %c0_58 = arith.constant 0 : index
      %c0_59 = arith.constant 0 : index
      %c0_60 = arith.constant 0 : index
      %110 = vector.load %arg2[%c0_58, %c0_59, %c0_60] : memref<1x64x32xf32, #tpu.memory_space<vmem>>, vector<1x64x32xf32>
      %111 = vector.shape_cast %110 : vector<1x64x32xf32> to vector<64x32xf32>
      %c0_61 = arith.constant 0 : index
      %c0_62 = arith.constant 0 : index
      %112 = vector.load %arg14[%c0_61, %c0_62] : memref<64x32xf32, #tpu.memory_space<vmem>>, vector<64x32xf32>
      tpu.vector_store %arg14[%c0_61, %c0_62], %111 {strides = array<i32>} : memref<64x32xf32, #tpu.memory_space<vmem>>, vector<64x32xf32>,
    } else {
    }
    %c0 = arith.constant 0 : index
    %c0_1 = arith.constant 0 : index
    %3 = vector.load %arg14[%c0, %c0_1] : memref<64x32xf32, #tpu.memory_space<vmem>>, vector<64x32xf32>
    %c0_2 = arith.constant 0 : index
    %c0_3 = arith.constant 0 : index
    %c0_4 = arith.constant 0 : index
    %4 = vector.load %arg3[%c0_2, %c0_3, %c0_4] : memref<1x1x32xf32, #tpu.memory_space<vmem>>, vector<1x1x32xf32>
    %5 = vector.shape_cast %4 : vector<1x1x32xf32> to vector<1x32xf32>
    %c0_5 = arith.constant 0 : index
    %c0_6 = arith.constant 0 : index
    %c0_7 = arith.constant 0 : index
    %6 = vector.load %arg4[%c0_5, %c0_6, %c0_7] : memref<1x1x32xf32, #tpu.memory_space<vmem>>, vector<1x1x32xf32>
    %7 = vector.shape_cast %6 : vector<1x1x32xf32> to vector<1x32xf32>
    %cst = arith.constant dense<0.000000e+00> : vector<64xf32>
    %8 = vector.multi_reduction <add>, %3, %cst [1] : vector<64x32xf32> to vector<64xf32>
    %9 = vector.shape_cast %8 : vector<64xf32> to vector<64x1xf32>
    %cst_8 = arith.constant 3.200000e+01 : f32
    %10 = vector.broadcast %cst_8 : f32 to vector<64x1xf32>
    %11 = arith.divf %9, %10 : vector<64x1xf32>
    %12 = vector.broadcast %11 : vector<64x1xf32> to vector<64x32xf32>
    %13 = arith.subf %3, %12 : vector<64x32xf32>
    %14 = arith.mulf %13, %13 : vector<64x32xf32>
    %cst_9 = arith.constant dense<0.000000e+00> : vector<64xf32>
    %15 = vector.multi_reduction <add>, %14, %cst_9 [1] : vector<64x32xf32> to vector<64xf32>
    %16 = vector.shape_cast %15 : vector<64xf32> to vector<64x1xf32>
    %cst_10 = arith.constant 3.200000e+01 : f32
    %17 = vector.broadcast %cst_10 : f32 to vector<64x1xf32>
    %18 = arith.divf %16, %17 : vector<64x1xf32>
    %cst_11 = arith.constant 9.99999974E-6 : f32
    %19 = vector.broadcast %cst_11 : f32 to vector<64x1xf32>
    %20 = arith.addf %18, %19 : vector<64x1xf32>
    %21 = math.rsqrt %20 : vector<64x1xf32>
    %22 = vector.broadcast %21 : vector<64x1xf32> to vector<64x32xf32>
    %23 = arith.mulf %13, %22 : vector<64x32xf32>
    %24 = vector.broadcast %5 : vector<1x32xf32> to vector<64x32xf32>
    %25 = arith.mulf %23, %24 : vector<64x32xf32>
    %26 = vector.broadcast %7 : vector<1x32xf32> to vector<64x32xf32>
    %27 = arith.addf %25, %26 : vector<64x32xf32>
    %c0_12 = arith.constant 0 : index
    %c0_13 = arith.constant 0 : index
    %c0_14 = arith.constant 0 : index
    %28 = vector.load %arg5[%c0_12, %c0_13, %c0_14] : memref<1x128x64xbf16, #tpu.memory_space<vmem>>, vector<1x128x64xbf16>
    %29 = vector.shape_cast %28 : vector<1x128x64xbf16> to vector<128x64xbf16>
    %30 = arith.truncf %27 : vector<64x32xf32> to vector<64x32xbf16>
    %cst_15 = arith.constant dense<0.000000e+00> : vector<128x32xf32>
    %31 = tpu.matmul %29, %30, %cst_15 {dimension_numbers = #tpu.dot_dimension_numbers<[1], [0], [0], [1], [0, 0, 1, 1], [], []>} : vector<128x64xbf16>, vector<64x32xbf16>, vector<128x32xf32> -> vector<128x32xf32>
    %c0_16 = arith.constant 0 : index
    %c0_17 = arith.constant 0 : index
    %c0_18 = arith.constant 0 : index
    %32 = vector.load %arg6[%c0_16, %c0_17, %c0_18] : memref<1x128x32xf32, #tpu.memory_space<vmem>>, vector<1x128x32xf32>
    %33 = vector.shape_cast %32 : vector<1x128x32xf32> to vector<128x32xf32>
    %34 = arith.addf %31, %33 : vector<128x32xf32>
    %cst_19 = arith.constant 5.000000e-01 : f32
    %35 = vector.broadcast %cst_19 : f32 to vector<128x32xf32>
    %36 = arith.mulf %35, %34 : vector<128x32xf32>
    %cst_20 = arith.constant 4.471500e-02 : f32
    %37 = vector.broadcast %cst_20 : f32 to vector<128x32xf32>
    %38 = arith.mulf %37, %34 : vector<128x32xf32>
    %39 = arith.mulf %38, %34 : vector<128x32xf32>
    %40 = arith.mulf %39, %34 : vector<128x32xf32>
    %41 = arith.addf %34, %40 : vector<128x32xf32>
    %cst_21 = arith.constant 0.797884583 : f32
    %42 = vector.broadcast %cst_21 : f32 to vector<128x32xf32>
    %43 = arith.mulf %42, %41 : vector<128x32xf32>
    %44 = math.tanh %43 : vector<128x32xf32>
    %cst_22 = arith.constant 1.000000e+00 : f32
    %45 = vector.broadcast %cst_22 : f32 to vector<128x32xf32>
    %46 = arith.addf %45, %44 : vector<128x32xf32>
    %47 = arith.mulf %36, %46 : vector<128x32xf32>
    %c0_23 = arith.constant 0 : index
    %c0_24 = arith.constant 0 : index
    %c0_25 = arith.constant 0 : index
    %48 = vector.load %arg7[%c0_23, %c0_24, %c0_25] : memref<1x64x128xbf16, #tpu.memory_space<vmem>>, vector<1x64x128xbf16>
    %49 = vector.shape_cast %48 : vector<1x64x128xbf16> to vector<64x128xbf16>
    %50 = arith.truncf %47 : vector<128x32xf32> to vector<128x32xbf16>
    %cst_26 = arith.constant dense<0.000000e+00> : vector<64x32xf32>
    %51 = tpu.matmul %49, %50, %cst_26 {dimension_numbers = #tpu.dot_dimension_numbers<[1], [0], [0], [1], [0, 0, 1, 1], [], []>} : vector<64x128xbf16>, vector<128x32xbf16>, vector<64x32xf32> -> vector<64x32xf32>
    %c0_27 = arith.constant 0 : index
    %c0_28 = arith.constant 0 : index
    %c0_29 = arith.constant 0 : index
    %52 = vector.load %arg8[%c0_27, %c0_28, %c0_29] : memref<1x64x32xf32, #tpu.memory_space<vmem>>, vector<1x64x32xf32>
    %53 = vector.shape_cast %52 : vector<1x64x32xf32> to vector<64x32xf32>
    %54 = arith.addf %51, %53 : vector<64x32xf32>
    %55 = arith.addf %54, %3 : vector<64x32xf32>
    %cst_30 = arith.constant dense<0.000000e+00> : vector<64xf32>
    %56 = vector.multi_reduction <add>, %55, %cst_30 [1] : vector<64x32xf32> to vector<64xf32>
    %57 = vector.shape_cast %56 : vector<64xf32> to vector<64x1xf32>
    %cst_31 = arith.constant 3.200000e+01 : f32
    %58 = vector.broadcast %cst_31 : f32 to vector<64x1xf32>
    %59 = arith.divf %57, %58 : vector<64x1xf32>
    %60 = vector.broadcast %59 : vector<64x1xf32> to vector<64x32xf32>
    %61 = arith.subf %55, %60 : vector<64x32xf32>
    %62 = arith.mulf %61, %61 : vector<64x32xf32>
    %cst_32 = arith.constant dense<0.000000e+00> : vector<64xf32>
    %63 = vector.multi_reduction <add>, %62, %cst_32 [1] : vector<64x32xf32> to vector<64xf32>
    %64 = vector.shape_cast %63 : vector<64xf32> to vector<64x1xf32>
    %cst_33 = arith.constant 3.200000e+01 : f32
    %65 = vector.broadcast %cst_33 : f32 to vector<64x1xf32>
    %66 = arith.divf %64, %65 : vector<64x1xf32>
    %cst_34 = arith.constant 9.99999974E-6 : f32
    %67 = vector.broadcast %cst_34 : f32 to vector<64x1xf32>
    %68 = arith.addf %66, %67 : vector<64x1xf32>
    %69 = math.rsqrt %68 : vector<64x1xf32>
    %70 = vector.broadcast %69 : vector<64x1xf32> to vector<64x32xf32>
    %71 = arith.mulf %61, %70 : vector<64x32xf32>
    %72 = vector.broadcast %5 : vector<1x32xf32> to vector<64x32xf32>
    %73 = arith.mulf %71, %72 : vector<64x32xf32>
    %74 = vector.broadcast %7 : vector<1x32xf32> to vector<64x32xf32>
    %75 = arith.addf %73, %74 : vector<64x32xf32>
    %76 = arith.truncf %75 : vector<64x32xf32> to vector<64x32xbf16>
    %c0_35 = arith.constant 0 : index
    %c0_36 = arith.constant 0 : index
    %c0_37 = arith.constant 0 : index
    %77 = vector.load %arg9[%c0_35, %c0_36, %c0_37] : memref<1x32x64xbf16, #tpu.memory_space<vmem>>, vector<1x32x64xbf16>
    %78 = vector.shape_cast %77 : vector<1x32x64xbf16> to vector<32x64xbf16>
    %cst_38 = arith.constant dense<0.000000e+00> : vector<64x64xf32>
    %79 = tpu.matmul %76, %78, %cst_38 {dimension_numbers = #tpu.dot_dimension_numbers<[1], [0], [0], [1], [0, 0, 1, 1], [], []>} : vector<64x32xbf16>, vector<32x64xbf16>, vector<64x64xf32> -> vector<64x64xf32>
    %c0_39 = arith.constant 0 : index
    %c0_40 = arith.constant 0 : index
    %c0_41 = arith.constant 0 : index
    %80 = vector.load %arg10[%c0_39, %c0_40, %c0_41] : memref<1x1x64xf32, #tpu.memory_space<vmem>>, vector<1x1x64xf32>
    %81 = vector.shape_cast %80 : vector<1x1x64xf32> to vector<1x64xf32>
    %82 = vector.broadcast %81 : vector<1x64xf32> to vector<64x64xf32>
    %83 = arith.addf %79, %82 : vector<64x64xf32>
    %cst_42 = arith.constant 5.000000e-01 : f32
    %84 = vector.broadcast %cst_42 : f32 to vector<64x64xf32>
    %85 = arith.mulf %84, %83 : vector<64x64xf32>
    %cst_43 = arith.constant 4.471500e-02 : f32
    %86 = vector.broadcast %cst_43 : f32 to vector<64x64xf32>
    %87 = arith.mulf %86, %83 : vector<64x64xf32>
    %88 = arith.mulf %87, %83 : vector<64x64xf32>
    %89 = arith.mulf %88, %83 : vector<64x64xf32>
    %90 = arith.addf %83, %89 : vector<64x64xf32>
    %cst_44 = arith.constant 0.797884583 : f32
    %91 = vector.broadcast %cst_44 : f32 to vector<64x64xf32>
    %92 = arith.mulf %91, %90 : vector<64x64xf32>
    %93 = math.tanh %92 : vector<64x64xf32>
    %cst_45 = arith.constant 1.000000e+00 : f32
    %94 = vector.broadcast %cst_45 : f32 to vector<64x64xf32>
    %95 = arith.addf %94, %93 : vector<64x64xf32>
    %96 = arith.mulf %85, %95 : vector<64x64xf32>
    %97 = arith.truncf %96 : vector<64x64xf32> to vector<64x64xbf16>
    %c0_46 = arith.constant 0 : index
    %c0_47 = arith.constant 0 : index
    %c0_48 = arith.constant 0 : index
    %98 = vector.load %arg11[%c0_46, %c0_47, %c0_48] : memref<1x64x32xbf16, #tpu.memory_space<vmem>>, vector<1x64x32xbf16>
    %99 = vector.shape_cast %98 : vector<1x64x32xbf16> to vector<64x32xbf16>
    %cst_49 = arith.constant dense<0.000000e+00> : vector<64x32xf32>
    %100 = tpu.matmul %97, %99, %cst_49 {dimension_numbers = #tpu.dot_dimension_numbers<[1], [0], [0], [1], [0, 0, 1, 1], [], []>} : vector<64x64xbf16>, vector<64x32xbf16>, vector<64x32xf32> -> vector<64x32xf32>
    %c0_50 = arith.constant 0 : index
    %c0_51 = arith.constant 0 : index
    %c0_52 = arith.constant 0 : index
    %101 = vector.load %arg12[%c0_50, %c0_51, %c0_52] : memref<1x1x32xf32, #tpu.memory_space<vmem>>, vector<1x1x32xf32>
    %102 = vector.shape_cast %101 : vector<1x1x32xf32> to vector<1x32xf32>
    %103 = vector.broadcast %102 : vector<1x32xf32> to vector<64x32xf32>
    %104 = arith.addf %100, %103 : vector<64x32xf32>
    %105 = arith.addf %104, %55 : vector<64x32xf32>
    %c0_53 = arith.constant 0 : index
    %c0_54 = arith.constant 0 : index
    %106 = vector.load %arg14[%c0_53, %c0_54] : memref<64x32xf32, #tpu.memory_space<vmem>>, vector<64x32xf32>
    tpu.vector_store %arg14[%c0_53, %c0_54], %105 {strides = array<i32>} : memref<64x32xf32, #tpu.memory_space<vmem>>, vector<64x32xf32>,
    %c0_55 = arith.constant 0 : index
    %c0_56 = arith.constant 0 : index
    %c0_57 = arith.constant 0 : index
    %107 = vector.load %arg13[%c0_55, %c0_56, %c0_57] : memref<1x64x32xf32, #tpu.memory_space<vmem>>, vector<1x64x32xf32>
    %108 = vector.shape_cast %107 : vector<1x64x32xf32> to vector<64x32xf32>
    %109 = vector.shape_cast %105 : vector<64x32xf32> to vector<1x64x32xf32>
    tpu.vector_store %arg13[%c0_55, %c0_56, %c0_57], %109 {strides = array<i32>} : memref<1x64x32xf32, #tpu.memory_space<vmem>>, vector<1x64x32xf32>,
    return
  }
  func.func @transform_0(%arg0: i32, %arg1: i32) -> (i32, i32, i32) {
    %c0_i32 = arith.constant 0 : i32
    %c0_i32_0 = arith.constant 0 : i32
    %c0_i32_1 = arith.constant 0 : i32
    return %arg0, %c0_i32, %c0_i32_0 : i32, i32, i32
  }
  func.func @transform_1(%arg0: i32, %arg1: i32) -> (i32, i32, i32) {
    %c0_i32 = arith.constant 0 : i32
    %c0_i32_0 = arith.constant 0 : i32
    %c0_i32_1 = arith.constant 0 : i32
    return %arg1, %c0_i32, %c0_i32_0 : i32, i32, i32
  }
  func.func @transform_2(%arg0: i32, %arg1: i32) -> (i32, i32, i32) {
    %c0_i32 = arith.constant 0 : i32
    %c0_i32_0 = arith.constant 0 : i32
    %c0_i32_1 = arith.constant 0 : i32
    return %arg1, %c0_i32, %c0_i32_0 : i32, i32, i32
  }
  func.func @transform_3(%arg0: i32, %arg1: i32) -> (i32, i32, i32) {
    %c0_i32 = arith.constant 0 : i32
    %c0_i32_0 = arith.constant 0 : i32
    %c0_i32_1 = arith.constant 0 : i32
    return %arg1, %c0_i32, %c0_i32_0 : i32, i32, i32
  }
  func.func @transform_4(%arg0: i32, %arg1: i32) -> (i32, i32, i32) {
    %c0_i32 = arith.constant 0 : i32
    %c0_i32_0 = arith.constant 0 : i32
    %c0_i32_1 = arith.constant 0 : i32
    return %arg1, %c0_i32, %c0_i32_0 : i32, i32, i32
  }
  func.func @transform_5(%arg0: i32, %arg1: i32) -> (i32, i32, i32) {
    %c0_i32 = arith.constant 0 : i32
    %c0_i32_0 = arith.constant 0 : i32
    %c0_i32_1 = arith.constant 0 : i32
    return %arg1, %c0_i32, %c0_i32_0 : i32, i32, i32
  }
  func.func @transform_6(%arg0: i32, %arg1: i32) -> (i32, i32, i32) {
    %c0_i32 = arith.constant 0 : i32
    %c0_i32_0 = arith.constant 0 : i32
    %c0_i32_1 = arith.constant 0 : i32
    return %arg1, %c0_i32, %c0_i32_0 : i32, i32, i32
  }
  func.func @transform_7(%arg0: i32, %arg1: i32) -> (i32, i32, i32) {
    %c0_i32 = arith.constant 0 : i32
    %c0_i32_0 = arith.constant 0 : i32
    %c0_i32_1 = arith.constant 0 : i32
    return %arg1, %c0_i32, %c0_i32_0 : i32, i32, i32
  }
  func.func @transform_8(%arg0: i32, %arg1: i32) -> (i32, i32, i32) {
    %c0_i32 = arith.constant 0 : i32
    %c0_i32_0 = arith.constant 0 : i32
    %c0_i32_1 = arith.constant 0 : i32
    return %arg1, %c0_i32, %c0_i32_0 : i32, i32, i32
  }
  func.func @transform_9(%arg0: i32, %arg1: i32) -> (i32, i32, i32) {
    %c0_i32 = arith.constant 0 : i32
    %c0_i32_0 = arith.constant 0 : i32
    %c0_i32_1 = arith.constant 0 : i32
    return %arg1, %c0_i32, %c0_i32_0 : i32, i32, i32
  }
  func.func @transform_10(%arg0: i32, %arg1: i32) -> (i32, i32, i32) {
    %c0_i32 = arith.constant 0 : i32
    %c0_i32_0 = arith.constant 0 : i32
    %c0_i32_1 = arith.constant 0 : i32
    return %arg1, %c0_i32, %c0_i32_0 : i32, i32, i32
  }
  func.func @transform_11(%arg0: i32, %arg1: i32) -> (i32, i32, i32) {
    %c0_i32 = arith.constant 0 : i32
    %c0_i32_0 = arith.constant 0 : i32
    %c0_i32_1 = arith.constant 0 : i32
    return %arg0, %c0_i32, %c0_i32_0 : i32, i32, i32
  }
}

</mosaic_0001>

<bundles_post_ra>
// kernel: tpu_custom_call.1
= control target key start
LH: loop header
LB: loop body
LE: loop exit
PB: predicated region body
PF: predicated region fallthrough
CT: control target
= control target key end

     0   :  { %s2240_s17 = smov 0   ;;  %s2242_s18 = smov 0   ;;  %s2837_s0 = inlined_call_operand.vmem [shape: f32[2,64,32], index: 0, kind: input, shape index: {}]   ;;  %s2838_s1 = inlined_call_operand.vmem [shape: f32[2,1,32], index: 1, kind: input, shape index: {}]   ;;  %s2839_s2 = inlined_call_operand.vmem [shape: f32[2,1,32], index: 2, kind: input, shape index: {}]   ;;  %s2840_s3 = inlined_call_operand.vmem [shape: bf16[2,128,64], index: 3, kind: input, shape index: {}]   ;;  %s2841_s4 = inlined_call_operand.vmem [shape: f32[2,128,32], index: 4, kind: input, shape index: {}]   ;;  %s2842_s5 = inlined_call_operand.vmem [shape: bf16[2,64,128], index: 5, kind: input, shape index: {}]   ;;  %s2843_s6 = inlined_call_operand.vmem [shape: f32[2,64,32], index: 6, kind: input, shape index: {}]   ;;  %s2844_s7 = inlined_call_operand.vmem [shape: bf16[2,32,64], index: 7, kind: input, shape index: {}]   ;;  %s2845_s8 = inlined_call_operand.vmem [shape: f32[2,1,64], index: 8, kind: input, shape index: {}]   ;;  %s2846_s9 = inlined_call_operand.vmem [shape: bf16[2,64,32], index: 9, kind: input, shape index: {}]   ;;  %s2847_s10 = inlined_call_operand.vmem [shape: f32[2,1,32], index: 10, kind: input, shape index: {}]   ;;  %s2848_s11 = inlined_call_operand.vmem [shape: f32[2,64,32], index: 11, kind: output, shape index: {}]  }
   0x1   :  { %2852 = sst [smem:[#allocation8_spill]] %s2837_s0  ;;  %s2244_s19 = smov 0  }
   0x2   :  { %2853 = sst [smem:[#allocation9_spill]] %s2839_s2  ;;  %s2246_s20 = smov 0  }
   0x3   :  { %2854 = sst [smem:[#allocation10_spill]] %s2840_s3  ;;  %s2248_s21 = smov 0  }
   0x4   :  { %2855 = sst [smem:[#allocation11_spill]] %s2841_s4 }
   0x5   :  { %2856 = sst [smem:[#allocation12_spill]] %s2842_s5 }
   0x6   :  { %2857 = sst [smem:[#allocation13_spill]] %s2843_s6 }
   0x7 LB: > { %2858 = sst [smem:[#allocation3_spill]] %s2170_s19  ;;  %s30_s22 = sadd.s32 1, %s2170_s19  ;;  %s2178_s21 = sphi %s2248_s21, %s21_s21   ;;  %s2174_s20 = sphi %s2246_s20, %s2876_s20   ;;  %s2170_s19 = sphi %s2244_s19, %s2875_s19   ;;  %s2166_s18 = sphi %s2242_s18, %s2874_s18   ;;  %s2162_s17 = sphi %s2240_s17, %s2873_s17  }
   0x8   : > { %2859 = sst [smem:[#allocation4_spill]] %s2174_s20  ;;  %s33_s23 = sadd.s32 1, %s2174_s20 }
   0x9   : > { %2860 = sst [smem:[#allocation5_spill]] %s2178_s21  ;;  %p31_p0 = scmp.ge.s32.totalorder %s30_s22, 2 }
   0xa   : > { %p1822_p1 = scmp.ge.s32.totalorder %s2178_s21, 1  ;;  %p441_p2 = scmp.lt.s32.totalorder %s2178_s21, 5 }
   0xb   : > { %s2878_s22 = smov (%p31_p0, %s30_s22), 0  ;;  %s2880_s23 = smov (!%p31_p0, %s33_s23), %s2174_s20 }
   0xc   : > { %2861 = sst [smem:[#allocation6_spill]] %s2878_s22  ;;  %p442_p3 = pnand %p1822_p1, %p441_p2 }
   0xd   : > { %p35_p4 = scmp.ge.s32.totalorder %s2880_s23, 2  ;;  %p523_p5 = scmp.lt.s32.totalorder (!%p442_p3), %s2166_s18, 1 }
   0xe   : > { %445 = sbr.rel (%p442_p3) target bundleno = 1663 (0x67f), region = 64  ;;  %p528_p6 = scmp.lt.s32.totalorder (!%p442_p3), %s2162_s17, 1 }
   0xf   : > { %s2882_s23 = smov (%p35_p4, %s2880_s23), 0  ;;  %s2863_s0 = sld [smem:[#allocation8_spill]] (!%p442_p3) }
  0x10   : > { %2862 = sst [smem:[#allocation7_spill]] %s2882_s23  ;;  %s2865_s3 = sld [smem:[#allocation10_spill]] (!%p442_p3) }
  0x11   : > { %s2866_s4 = sld [smem:[#allocation11_spill]] (!%p442_p3)  ;;  %s2867_s5 = sld [smem:[#allocation12_spill]] (!%p442_p3) }
  0x12   : > { %s2868_s6 = sld [smem:[#allocation13_spill]] (!%p442_p3)  ;;  %p1839_p7 = scmp.ne.s32.totalorder (!%p442_p3), %s2162_s17, 0 }
  0x15   : > { %s2884_s18 = smov (!%p523_p5, %s2166_s18), 1  ;;  %vm588_vm0 = vcmask (!%p1839_p7), 261120  }
  0x16   : > { %s2274_s24 = scalar_select %p528_p6, %s2162_s17, 1 }
  0x17   : > { %s1880_s25 = sshll.u32 %s2884_s18, 6 }
  0x18   : > { %s2279_s28 = scalar_lea.vmem %s2863_s0, %s1880_s25  ;;  %s1881_s16 = sshll.u32 %s2274_s24, 6 }
  0x19   : > { %s2293_s20 = scalar_lea.vmem %s2865_s3, %s1881_s16  ;;  %s1882_s18 = sshll.u32 %s2274_s24, 7  ;;  %v580_v0 = vld [vmem:[%s2279_s28] sm:$0xff] (!%p1839_p7)  ;;  %v581_v1 = vld [vmem:[%s2279_s28 + $0x8] sm:$0xff] (!%p1839_p7)  ;;  %v582_v2 = vld [vmem:[%s2279_s28 + $0x10] sm:$0xff] (!%p1839_p7) }
  0x1a   : > { %s2299_s26 = scalar_lea.vmem %s2866_s4, %s1882_s18  ;;  %s1883_s27 = sshll.u32 %s2274_s24, 5  ;;  %589 = vst.msk [vmem:[#allocation2] sm:$0xff] (!%p1839_p7), %vm588_vm0, %v580_v0  ;;  %590 = vst.msk [vmem:[#allocation2 + $0x8] sm:$0xff] (!%p1839_p7), %vm588_vm0, %v581_v1  ;;  %v583_v3 = vld [vmem:[%s2279_s28 + $0x18] sm:$0xff] (!%p1839_p7)  ;;  %v584_v4 = vld [vmem:[%s2279_s28 + $0x20] sm:$0xff] (!%p1839_p7) }
  0x1b   : > { %s2305_s30 = scalar_lea.vmem %s2867_s5, %s1883_s27  ;;  %s2310_s15 = scalar_lea.vmem %s2868_s6, %s1881_s16  ;;  %591 = vst.msk [vmem:[#allocation2 + $0x10] sm:$0xff] (!%p1839_p7), %vm588_vm0, %v582_v2  ;;  %v585_v5 = vld [vmem:[%s2279_s28 + $0x28] sm:$0xff] (!%p1839_p7)  ;;  %592 = vst.msk [vmem:[#allocation2 + $0x18] sm:$0xff] (!%p1839_p7), %vm588_vm0, %v583_v3  ;;  %v586_v6 = vld [vmem:[%s2279_s28 + $0x30] sm:$0xff] (!%p1839_p7) }
  0x1c   : > { %s1885_s22 = sshll.u32 %s2274_s24, 4  ;;  %s561_s3 = scalar_lea.vmem %s2845_s8, %s2274_s24  ;;  %593 = vst.msk [vmem:[#allocation2 + $0x20] sm:$0xff] (!%p1839_p7), %vm588_vm0, %v584_v4  ;;  %594 = vst.msk [vmem:[#allocation2 + $0x28] sm:$0xff] (!%p1839_p7), %vm588_vm0, %v585_v5  ;;  %v587_v7 = vld [vmem:[%s2279_s28 + $0x38] sm:$0xff] (!%p1839_p7) }
  0x1d   : > { %s2320_s21 = scalar_lea.vmem %s2844_s7, %s1885_s22  ;;  %s2325_s0 = scalar_lea.vmem %s2846_s9, %s1883_s27  ;;  %595 = vst.msk [vmem:[#allocation2 + $0x30] sm:$0xff] (!%p1839_p7), %vm588_vm0, %v586_v6  ;;  %596 = vst.msk [vmem:[#allocation2 + $0x38] sm:$0xff] (!%p1839_p7), %vm588_vm0, %v587_v7 }
  0x1e   : > { %s569_s16 = scalar_lea.vmem %s2847_s10, %s2274_s24  ;;  %s2334_s6 = scalar_lea.vmem %s2848_s11, %s1880_s25 }
  0x1f   : > { %579 = sbr.rel (%p1839_p7) target bundleno = 38 (0x26), region = 68 }
  0x26 PF: > { %v2345_v8 = vld [vmem:[#allocation2] sm:$0xff]  ;;  %vm607_vm1 = vcmask 261120   ;;  %v2347_v9 = vld [vmem:[#allocation2 + $0x10] sm:$0xff]  ;;  %v2349_v10 = vld [vmem:[#allocation2 + $0x8] sm:$0xff]  ;;  %vm817_vm2 = vcmask 523264   ;;  %s2869_s5 = scalar_lea.vmem %s2838_s1, %s2274_s24  ;;  %s2870_s28 = sld [smem:[#allocation9_spill]] }
  0x27   : > { %v608_v11 = vsel %vm607_vm1, %v2345_v8, 0.0  ;;  %v614_v12 = vsel %vm607_vm1, %v2347_v9, 0.0  ;;  %v2355_v13 = vld [vmem:[#allocation2 + $0x18] sm:$0xff]  ;;  %v2357_v14 = vld [vmem:[#allocation2 + $0x20] sm:$0xff]  ;;  %v2359_v15 = vld [vmem:[#allocation2 + $0x28] sm:$0xff]  ;;  %v611_v16 = vsel %vm607_vm1, %v2349_v10, 0.0 }
  0x28   : > { %609 = vadd.xlane.f32.xlu0 %v608_v11  ;;  %615 = vadd.xlane.f32.xlu1 %v614_v12  ;;  %v617_v17 = vsel %vm607_vm1, %v2355_v13, 0.0  ;;  %v620_v18 = vsel %vm607_vm1, %v2357_v14, 0.0  ;;  %v623_v19 = vsel %vm607_vm1, %v2359_v15, 0.0  ;;  %v2369_v20 = vld [vmem:[#allocation2 + $0x30] sm:$0xff]  ;;  %v2371_v21 = vld [vmem:[#allocation2 + $0x38] sm:$0xff]  ;;  %v2042_v0 = vld [vmem:[%s2293_s20] sm:$0xff]  }
  0x29   : > { %v626_v22 = vsel %vm607_vm1, %v2369_v20, 0.0  ;;  %v629_v23 = vsel %vm607_vm1, %v2371_v21, 0.0  ;;  %1934 = vmatprep.mubr.msk.bf16.mxu0 %vm817_vm2, %v2042_v0 }
  0x2c   : > { %612 = vadd.xlane.f32.xlu0 %v611_v16  ;;  %618 = vadd.xlane.f32.xlu1 %v617_v17  ;;  %s2871_s12 = scalar_lea.vmem %s2870_s28, %s2274_s24 }
  0x30   : > { %621 = vadd.xlane.f32.xlu0 %v620_v18  ;;  %624 = vadd.xlane.f32.xlu1 %v623_v19 }
  0x34   : > { %627 = vadd.xlane.f32.xlu0 %v626_v22  ;;  %630 = vadd.xlane.f32.xlu1 %v629_v23 }
  0xb5   : > { %v610_v24 = vpop.xlane.xlu0 %609  ;;  %v616_v25 = vpop.xlane.xlu1 %615 }
  0xb6   : > { %v633_v26 = vmul.f32 0.03125, %v610_v24  ;;  %v635_v27 = vmul.f32 0.03125, %v616_v25 }
  0xb8   : > { %v2378_v28 = vsub.f32 %v2345_v8, %v633_v26  ;;  %v2381_v29 = vsub.f32 %v2347_v9, %v635_v27 }
  0xb9   : > { %v613_v30 = vpop.xlane.xlu0 %612  ;;  %v619_v31 = vpop.xlane.xlu1 %618 }
  0xba   : > { %v634_v32 = vmul.f32 0.03125, %v613_v30  ;;  %v636_v33 = vmul.f32 0.03125, %v619_v31  ;;  %v649_v34 = vmul.f32 %v2378_v28, %v2378_v28  ;;  %v651_v35 = vmul.f32 %v2381_v29, %v2381_v29 }
  0xbc   : > { %v2388_v36 = vsub.f32 %v2349_v10, %v634_v32  ;;  %v2391_v37 = vsub.f32 %v2355_v13, %v636_v33  ;;  %v657_v38 = vsel %vm607_vm1, %v649_v34, 0.0  ;;  %v663_v41 = vsel %vm607_vm1, %v651_v35, 0.0 }
  0xbd   : > { %658 = vadd.xlane.f32.xlu0 %v657_v38  ;;  %v622_v39 = vpop.xlane.xlu0 %621  ;;  %v625_v40 = vpop.xlane.xlu1 %624  ;;  %v2433_v38 = vld [vmem:[%s2869_s5] ss:$0 sm:$0xff] }
  0xbe   : > { %v637_v42 = vmul.f32 0.03125, %v622_v39  ;;  %v638_v43 = vmul.f32 0.03125, %v625_v40  ;;  %v650_v44 = vmul.f32 %v2388_v36, %v2388_v36  ;;  %v652_v45 = vmul.f32 %v2391_v37, %v2391_v37 }
  0xc0   : > { %v2400_v46 = vsub.f32 %v2357_v14, %v637_v42  ;;  %v2403_v47 = vsub.f32 %v2359_v15, %v638_v43  ;;  %v660_v48 = vsel %vm607_vm1, %v650_v44, 0.0  ;;  %v666_v51 = vsel %vm607_vm1, %v652_v45, 0.0 }
  0xc1   : > { %664 = vadd.xlane.f32.xlu0 %v663_v41  ;;  %661 = vadd.xlane.f32.xlu1 %v660_v48  ;;  %v628_v49 = vpop.xlane.xlu0 %627  ;;  %v631_v50 = vpop.xlane.xlu1 %630 }
  0xc2   : > { %v639_v52 = vmul.f32 0.03125, %v628_v49  ;;  %v640_v53 = vmul.f32 0.03125, %v631_v50  ;;  %v653_v54 = vmul.f32 %v2400_v46, %v2400_v46  ;;  %v654_v55 = vmul.f32 %v2403_v47, %v2403_v47 }
  0xc4   : > { %v2412_v56 = vsub.f32 %v2369_v20, %v639_v52  ;;  %v2415_v57 = vsub.f32 %v2371_v21, %v640_v53  ;;  %v669_v58 = vsel %vm607_vm1, %v653_v54, 0.0  ;;  %v672_v59 = vsel %vm607_vm1, %v654_v55, 0.0 }
  0xc5   : > { %667 = vadd.xlane.f32.xlu1 %v666_v51  ;;  %670 = vadd.xlane.f32.xlu0 %v669_v58 }
  0xc6   : > { %v655_v60 = vmul.f32 %v2412_v56, %v2412_v56  ;;  %v656_v61 = vmul.f32 %v2415_v57, %v2415_v57 }
  0xc8   : > { %v675_v62 = vsel %vm607_vm1, %v655_v60, 0.0  ;;  %v678_v63 = vsel %vm607_vm1, %v656_v61, 0.0 }
  0xc9   : > { %673 = vadd.xlane.f32.xlu1 %v672_v59  ;;  %676 = vadd.xlane.f32.xlu0 %v675_v62 }
  0xcd   : > { %679 = vadd.xlane.f32.xlu1 %v678_v63 }
 0x14a   : > { %v659_v1 = vpop.xlane.xlu0 %658 }
 0x14b   : > { %v681_v2 = vmul.f32 0.03125, %v659_v1 }
 0x14d   : > { %v689_v3 = vadd.f32 1e-05, %v681_v2 }
 0x14e   : > { %v662_v4 = vpop.xlane.xlu1 %661  ;;  %v665_v5 = vpop.xlane.xlu0 %664 }
 0x14f   : > { %2060 = vrsqrt.f32 %v689_v3  ;;  %v682_v6 = vmul.f32 0.03125, %v662_v4  ;;  %v683_v7 = vmul.f32 0.03125, %v665_v5 }
 0x151   : > { %v690_v11 = vadd.f32 1e-05, %v682_v6  ;;  %v691_v12 = vadd.f32 1e-05, %v683_v7 }
 0x152   : > { %v668_v16 = vpop.xlane.xlu1 %667  ;;  %v671_v17 = vpop.xlane.xlu0 %670 }
 0x153   : > { %2062 = vrsqrt.f32 %v690_v11  ;;  %v684_v18 = vmul.f32 0.03125, %v668_v16  ;;  %v685_v19 = vmul.f32 0.03125, %v671_v17  ;;  %v2044_v11 = vld [vmem:[%s2293_s20 + $0x10] sm:$0xff]   ;;  %v2046_v16 = vld [vmem:[%s2293_s20 + $0x20] sm:$0xff]   ;;  %v2047_v17 = vld [vmem:[%s2293_s20 + $0x28] sm:$0xff]  }
 0x154   : > { %2064 = vrsqrt.f32 %v691_v12  ;;  %v2045_v12 = vld [vmem:[%s2293_s20 + $0x18] sm:$0xff]  }
 0x155   : > { %v692_v22 = vadd.f32 1e-05, %v684_v18  ;;  %v693_v23 = vadd.f32 1e-05, %v685_v19  ;;  %v2048_v18 = vld [vmem:[%s2293_s20 + $0x30] sm:$0xff]   ;;  %v2049_v19 = vld [vmem:[%s2293_s20 + $0x38] sm:$0xff]  }
 0x156   : > { %v674_v24 = vpop.xlane.xlu1 %673  ;;  %v677_v25 = vpop.xlane.xlu0 %676 }
 0x157   : > { %2066 = vrsqrt.f32 %v692_v22  ;;  %v686_v26 = vmul.f32 0.03125, %v674_v24  ;;  %v687_v27 = vmul.f32 0.03125, %v677_v25  ;;  %v2050_v22 = vld [vmem:[%s2305_s30] sm:$0xff]  }
 0x158   : > { %2068 = vrsqrt.f32 %v693_v23  ;;  %1966 = vmatprep.mubr.bf16.mxu1 %v2050_v22  ;;  %v763_v23 = vld [vmem:[%s2299_s26 + $0x10] sm:$0xff]  ;;  %v761_v24 = vld [vmem:[%s2299_s26] sm:$0xff] }
 0x159   : > { %v2061_v30 = vpop.eup %2060  ;;  %v694_v31 = vadd.f32 1e-05, %v686_v26  ;;  %v695_v32 = vadd.f32 1e-05, %v687_v27  ;;  %v764_v26 = vld [vmem:[%s2299_s26 + $0x18] sm:$0xff]  ;;  %v769_v22 = vld [vmem:[%s2299_s26 + $0x40] sm:$0xff] }
 0x15a   : > { %v680_v33 = vpop.xlane.xlu1 %679  ;;  %v705_v34 = vmul.f32 %v2061_v30, %v2378_v28  ;;  %v2442_v28 = vld [vmem:[%s2871_s12] ss:$0 sm:$0xff] }
 0x15b   : > { %2070 = vrsqrt.f32 %v694_v31  ;;  %v688_v35 = vmul.f32 0.03125, %v680_v33  ;;  %v762_v31 = vld [vmem:[%s2299_s26 + $0x8] sm:$0xff] }
 0x15c   : > { %2072 = vrsqrt.f32 %v695_v32  ;;  %v719_v43 = vmul.f32 %v2433_v38, %v705_v34 }
 0x15d   : > { %v2063_v39 = vpop.eup %2062  ;;  %v696_v40 = vadd.f32 1e-05, %v688_v35 }
 0x15e   : > { %v2065_v41 = vpop.eup %2064  ;;  %v706_v42 = vmul.f32 %v2063_v39, %v2388_v36  ;;  %v733_v50 = vadd.f32 %v2442_v28, %v719_v43 }
 0x15f   : > { %2074 = vrsqrt.f32 %v696_v40  ;;  %v707_v44 = vmul.f32 %v2065_v41, %v2381_v29 }
 0x160   : > { %v720_v45 = vmul.f32 %v2433_v38, %v706_v42 }
 0x161   : > { %v2067_v48 = vpop.eup %2066  ;;  %v721_v52 = vmul.f32 %v2433_v38, %v707_v44 }
 0x162   : > { %v2069_v49 = vpop.eup %2068  ;;  %v734_v51 = vadd.f32 %v2442_v28, %v720_v45  ;;  %v708_v36 = vmul.f32 %v2067_v48, %v2391_v37  ;;  %v767_v48 = vld [vmem:[%s2299_s26 + $0x30] sm:$0xff] }
 0x163   : > { %v709_v53 = vmul.f32 %v2069_v49, %v2400_v46  ;;  %v735_v29 = vadd.f32 %v2442_v28, %v721_v52 }
 0x164   : > { %v757_v54 = vpack.c.bf16 %v734_v51, %v733_v50  ;;  %v722_v55 = vmul.f32 %v2433_v38, %v708_v36  ;;  %v765_v51 = vld [vmem:[%s2299_s26 + $0x20] sm:$0xff] }
 0x165   : > { %v2071_v58 = vpop.eup %2070  ;;  %v723_v62 = vmul.f32 %v2433_v38, %v709_v53  ;;  %v768_v53 = vld [vmem:[%s2299_s26 + $0x38] sm:$0xff] }
 0x166   : > { %v2073_v59 = vpop.eup %2072  ;;  %1926 = vmatprep.subr.bf16.mxu0 %v757_v54  ;;  %v736_v60 = vadd.f32 %v2442_v28, %v722_v55  ;;  %v710_v61 = vmul.f32 %v2071_v58, %v2403_v47 }
 0x167   : > { %1927 = vmatpush3.bf16.msra.mxu0 %v757_v54  ;;  %v711_v37 = vmul.f32 %v2073_v59, %v2412_v56  ;;  %v737_v1 = vadd.f32 %v2442_v28, %v723_v62 }
 0x168   : > { %v758_v63 = vpack.c.bf16 %v736_v60, %v735_v29  ;;  %v724_v46 = vmul.f32 %v2433_v38, %v710_v61  ;;  %v766_v29 = vld [vmem:[%s2299_s26 + $0x28] sm:$0xff] }
 0x169   : > { %v2075_v0 = vpop.eup %2074  ;;  %v725_v47 = vmul.f32 %v2433_v38, %v711_v37 }
 0x16a   : > { %1928 = vmatprep.subr.bf16.mxu0 %v758_v63  ;;  %v738_v2 = vadd.f32 %v2442_v28, %v724_v46  ;;  %v712_v3 = vmul.f32 %v2075_v0, %v2415_v57  ;;  %v2043_v57 = vld [vmem:[%s2293_s20 + $0x8] sm:$0xff]  }
 0x16b   : > { %1929 = vmatpush3.bf16.msra.mxu0 %v758_v63  ;;  %v739_v5 = vadd.f32 %v2442_v28, %v725_v47 }
 0x16c   : > { %v759_v4 = vpack.c.bf16 %v738_v2, %v737_v1  ;;  %v726_v56 = vmul.f32 %v2433_v38, %v712_v3 }
 0x16e   : > { %1930 = vmatprep.subr.bf16.mxu0 %v759_v4  ;;  %v740_v6 = vadd.f32 %v2442_v28, %v726_v56 }
 0x16f   : > { %1931 = vmatpush3.bf16.msra.mxu0 %v759_v4 }
 0x170   : > { %v760_v7 = vpack.c.bf16 %v740_v6, %v739_v5 }
 0x172   : > { %1932 = vmatprep.subr.bf16.mxu0 %v760_v7 }
 0x173   : > { %1933 = vmatpush3.bf16.msra.mxu0 %v760_v7 }
 0x176   : > { %1935 = vmatmul.mubr.msk.bf16.vlgmr.msra.gmra.mrb[0].mxu0 %vm817_vm2, %v2043_v57 }
 0x177   : > { %1938 = vmatprep.mubr.msk.bf16.mxu0 %vm817_vm2, %v2044_v11 }
 0x17e   : > { %1939 = vmatmul.mubr.msk.bf16.gmra.mrb[4].mxu0 %vm817_vm2, %v2045_v12 }
 0x17f   : > { %1942 = vmatprep.mubr.msk.bf16.mxu0 %vm817_vm2, %v2046_v16  ;;  %v771_v16 = vld [vmem:[%s2299_s26 + $0x50] sm:$0xff] }
 0x186   : > { %1943 = vmatmul.mubr.msk.bf16.gmra.mrb[8].mxu0 %vm817_vm2, %v2047_v17 }
 0x187   : > { %1946 = vmatprep.mubr.msk.bf16.mxu0 %vm817_vm2, %v2048_v18 }
 0x18e   : > { %1947 = vmatmul.mubr.msk.bf16.gmra.mrb[12].mxu0 %vm817_vm2, %v2049_v19 }
 0x249   : > { %v1936_v25 = vpop.f32.mrb[0].mxu0 }
 0x24a   : > { %v885_v27 = vadd.f32 %v1936_v25, %v763_v23  ;;  %v876_v30 = vpop.f32.mrb[1].mxu0 }
 0x24b   : > { %v2484_v32 = vadd.f32 %v876_v30, %v761_v24  ;;  %v1937_v33 = vpop.f32.mrb[2].mxu0 }
 0x24c   : > { %v957_v34 = vmul.f32 0.044715, %v885_v27  ;;  %v2486_v35 = vadd.f32 %v1937_v33, %v764_v26  ;;  %v879_v39 = vpop.f32.mrb[3].mxu0  ;;  %v772_v26 = vld [vmem:[%s2299_s26 + $0x58] sm:$0xff] }
 0x24d   : > { %v955_v40 = vmul.f32 0.044715, %v2484_v32  ;;  %v2489_v41 = vadd.f32 %v879_v39, %v762_v31  ;;  %v941_v39 = vmul.f32 0.5, %v885_v27 }
 0x24e   : > { %v973_v42 = vmul.f32 %v957_v34, %v885_v27  ;;  %v958_v43 = vmul.f32 0.044715, %v2486_v35  ;;  %v770_v34 = vld [vmem:[%s2299_s26 + $0x48] sm:$0xff] }
 0x24f   : > { %v971_v44 = vmul.f32 %v955_v40, %v2484_v32  ;;  %v956_v45 = vmul.f32 0.044715, %v2489_v41 }
 0x250   : > { %v989_v49 = vmul.f32 %v973_v42, %v885_v27  ;;  %v974_v50 = vmul.f32 %v958_v43, %v2486_v35 }
 0x251   : > { %v972_v36 = vmul.f32 %v956_v45, %v2489_v41  ;;  %v1940_v52 = vpop.f32.mrb[4].mxu0  ;;  %v987_v54 = vmul.f32 %v971_v44, %v2484_v32 }
 0x252   : > { %v990_v55 = vmul.f32 %v974_v50, %v2486_v35  ;;  %v2501_v58 = vadd.f32 %v1940_v52, %v767_v48  ;;  %v892_v59 = vpop.f32.mrb[5].mxu0  ;;  %v1005_v60 = vadd.f32 %v989_v49, %v885_v27 }
 0x253   : > { %v2504_v61 = vadd.f32 %v892_v59, %v765_v51  ;;  %v1941_v62 = vpop.f32.mrb[6].mxu0  ;;  %v988_v37 = vmul.f32 %v972_v36, %v2489_v41  ;;  %v1003_v63 = vadd.f32 %v987_v54, %v2484_v32  ;;  %v939_v51 = vmul.f32 0.5, %v2484_v32 }
 0x254   : > { %v961_v46 = vmul.f32 0.044715, %v2501_v58  ;;  %v2509_v0 = vadd.f32 %v1941_v62, %v768_v53  ;;  %v895_v1 = vpop.f32.mrb[7].mxu0  ;;  %v1006_v2 = vadd.f32 %v990_v55, %v2486_v35  ;;  %v1021_v3 = vmul.f32 0.7978846, %v1005_v60 }
 0x255   : > { %v959_v47 = vmul.f32 0.044715, %v2504_v61  ;;  %v2513_v4 = vadd.f32 %v895_v1, %v766_v29  ;;  %v1004_v56 = vadd.f32 %v988_v37, %v2489_v41  ;;  %v1019_v5 = vmul.f32 0.7978846, %v1003_v63  ;;  %v775_v37 = vld [vmem:[%s2299_s26 + $0x70] sm:$0xff] }
 0x256   : > { %v977_v6 = vmul.f32 %v961_v46, %v2501_v58  ;;  %v962_v7 = vmul.f32 0.044715, %v2509_v0  ;;  %v1022_v57 = vmul.f32 0.7978846, %v1006_v2  ;;  %2076 = vtanh.f32 %v1021_v3  ;;  %v773_v2 = vld [vmem:[%s2299_s26 + $0x60] sm:$0xff] }
 0x257   : > { %v975_v11 = vmul.f32 %v959_v47, %v2504_v61  ;;  %v960_v12 = vmul.f32 0.044715, %v2513_v4  ;;  %v1020_v17 = vmul.f32 0.7978846, %v1004_v56  ;;  %2078 = vtanh.f32 %v1019_v5 }
 0x258   : > { %v993_v18 = vmul.f32 %v977_v6, %v2501_v58  ;;  %v978_v19 = vmul.f32 %v962_v7, %v2509_v0  ;;  %2080 = vtanh.f32 %v1022_v57  ;;  %v940_v3 = vmul.f32 0.5, %v2489_v41  ;;  %v776_v7 = vld [vmem:[%s2299_s26 + $0x78] sm:$0xff] }
 0x259   : > { %v991_v23 = vmul.f32 %v975_v11, %v2504_v61  ;;  %v976_v24 = vmul.f32 %v960_v12, %v2513_v4  ;;  %v1944_v25 = vpop.f32.mrb[8].mxu0  ;;  %2082 = vtanh.f32 %v1020_v17  ;;  %v942_v47 = vmul.f32 0.5, %v2486_v35 }
 0x25a   : > { %v994_v30 = vmul.f32 %v978_v19, %v2509_v0  ;;  %v2528_v31 = vadd.f32 %v1944_v25, %v771_v16  ;;  %v908_v33 = vpop.f32.mrb[9].mxu0  ;;  %v1009_v45 = vadd.f32 %v993_v18, %v2501_v58  ;;  %v943_v11 = vmul.f32 0.5, %v2504_v61  ;;  %v774_v19 = vld [vmem:[%s2299_s26 + $0x68] sm:$0xff] }
 0x25b   : > { %v992_v40 = vmul.f32 %v976_v24, %v2513_v4  ;;  %v2532_v42 = vadd.f32 %v908_v33, %v769_v22  ;;  %v1945_v43 = vpop.f32.mrb[10].mxu0  ;;  %v1007_v44 = vadd.f32 %v991_v23, %v2504_v61 }
 0x25c   : > { %v965_v48 = vmul.f32 0.044715, %v2528_v31  ;;  %v2537_v49 = vadd.f32 %v1945_v43, %v772_v26  ;;  %v911_v50 = vpop.f32.mrb[11].mxu0  ;;  %v1010_v36 = vadd.f32 %v994_v30, %v2509_v0  ;;  %v1025_v29 = vmul.f32 0.7978846, %v1009_v45 }
 0x25d   : > { %v963_v27 = vmul.f32 0.044715, %v2532_v42  ;;  %v2542_v52 = vadd.f32 %v911_v50, %v770_v34  ;;  %v1008_v53 = vadd.f32 %v992_v40, %v2513_v4  ;;  %v1023_v54 = vmul.f32 0.7978846, %v1007_v44 }
 0x25e   : > { %v981_v55 = vmul.f32 %v965_v48, %v2528_v31  ;;  %v966_v59 = vmul.f32 0.044715, %v2537_v49  ;;  %v1026_v60 = vmul.f32 0.7978846, %v1010_v36 }
 0x25f   : > { %v979_v62 = vmul.f32 %v963_v27, %v2532_v42  ;;  %v964_v32 = vmul.f32 0.044715, %v2542_v52  ;;  %v1024_v63 = vmul.f32 0.7978846, %v1008_v53  ;;  %2084 = vtanh.f32 %v1023_v54 }
 0x260   : > { %v2077_v46 = vpop.eup %2076  ;;  %v982_v1 = vmul.f32 %v966_v59, %v2537_v49  ;;  %2086 = vtanh.f32 %v1025_v29  ;;  %v997_v22 = vmul.f32 %v981_v55, %v2528_v31 }
 0x261   : > { %v2079_v56 = vpop.eup %2078  ;;  %v980_v5 = vmul.f32 %v964_v32, %v2542_v52  ;;  %v1948_v6 = vpop.f32.mrb[12].mxu0  ;;  %v1053_v57 = vadd.f32 1.0, %v2077_v46  ;;  %2088 = vtanh.f32 %v1024_v63  ;;  %v995_v16 = vmul.f32 %v979_v62, %v2532_v42 }
 0x262   : > { %v2081_v12 = vpop.eup %2080  ;;  %v2558_v17 = vadd.f32 %v1948_v6, %v775_v37  ;;  %v924_v18 = vpop.f32.mrb[13].mxu0  ;;  %v1051_v41 = vadd.f32 1.0, %v2079_v56  ;;  %2090 = vtanh.f32 %v1026_v60  ;;  %v998_v61 = vmul.f32 %v982_v1, %v2537_v49 }
 0x263   : > { %v2083_v35 = vpop.eup %2082  ;;  %v996_v23 = vmul.f32 %v980_v5, %v2542_v52  ;;  %v2563_v24 = vadd.f32 %v924_v18, %v773_v2  ;;  %v1949_v25 = vpop.f32.mrb[14].mxu0  ;;  %v1054_v26 = vadd.f32 1.0, %v2081_v12  ;;  %v1069_v45 = vmul.f32 %v1053_v57, %v941_v39 }
 0x264   : > { %v969_v30 = vmul.f32 0.044715, %v2558_v17  ;;  %v2567_v33 = vadd.f32 %v1949_v25, %v776_v7  ;;  %v927_v34 = vpop.f32.mrb[15].mxu0  ;;  %v1052_v40 = vadd.f32 1.0, %v2083_v35  ;;  %v1067_v36 = vmul.f32 %v1051_v41, %v939_v51 }
 0x265   : > { %v967_v43 = vmul.f32 0.044715, %v2563_v24  ;;  %v2570_v44 = vadd.f32 %v927_v34, %v774_v19  ;;  %v1070_v48 = vmul.f32 %v1054_v26, %v942_v47  ;;  %v1011_v53 = vadd.f32 %v995_v16, %v2532_v42 }
 0x266   : > { %v970_v50 = vmul.f32 0.044715, %v2567_v33  ;;  %v1068_v27 = vmul.f32 %v1052_v40, %v940_v3  ;;  %v1012_v29 = vadd.f32 %v996_v23, %v2542_v52  ;;  %v985_v60 = vmul.f32 %v969_v30, %v2558_v17 }
 0x267   : > { %v983_v54 = vmul.f32 %v967_v43, %v2563_v24  ;;  %v968_v55 = vmul.f32 0.044715, %v2570_v44  ;;  %v1092_v59 = vpack.c.bf16 %v1070_v48, %v1069_v45  ;;  %v944_v32 = vmul.f32 0.5, %v2513_v4 }
 0x268   : > { %v1091_v62 = vpack.c.bf16 %v1068_v27, %v1067_v36  ;;  %v1027_v39 = vmul.f32 0.7978846, %v1011_v53  ;;  %v986_v63 = vmul.f32 %v970_v50, %v2567_v33  ;;  %v945_v46 = vmul.f32 0.5, %v2501_v58 }
 0x269   : > { %v2085_v37 = vpop.eup %2084  ;;  %v984_v51 = vmul.f32 %v968_v55, %v2570_v44  ;;  %v1028_v1 = vmul.f32 0.7978846, %v1012_v29  ;;  %v999_v3 = vmul.f32 %v983_v54, %v2563_v24  ;;  %v1013_v56 = vadd.f32 %v997_v22, %v2528_v31 }
 0x26a   : > { %v2087_v2 = vpop.eup %2086  ;;  %1950 = vmatprep.subr.bf16.mxu1 %v1091_v62  ;;  %v1055_v47 = vadd.f32 1.0, %v2085_v37  ;;  %2092 = vtanh.f32 %v1027_v39  ;;  %v1014_v7 = vadd.f32 %v998_v61, %v2537_v49  ;;  %v1001_v58 = vmul.f32 %v985_v60, %v2558_v17 }
 0x26b   : > { %v2089_v5 = vpop.eup %2088  ;;  %v1000_v4 = vmul.f32 %v984_v51, %v2570_v44  ;;  %1951 = vmatpush3.bf16.msra.mxu1 %v1091_v62  ;;  %v1057_v6 = vadd.f32 1.0, %v2087_v2  ;;  %2094 = vtanh.f32 %v1028_v1  ;;  %v946_v16 = vmul.f32 0.5, %v2509_v0 }
 0x26c   : > { %v2091_v57 = vpop.eup %2090  ;;  %1952 = vmatprep.subr.bf16.mxu1 %v1092_v59  ;;  %v1056_v12 = vadd.f32 1.0, %v2089_v5  ;;  %v1029_v18 = vmul.f32 0.7978846, %v1013_v56  ;;  %v1002_v19 = vmul.f32 %v986_v63, %v2567_v33  ;;  %v1071_v41 = vmul.f32 %v1055_v47, %v943_v11 }
 0x26d   : > { %v1058_v35 = vadd.f32 1.0, %v2091_v57  ;;  %v1030_v22 = vmul.f32 0.7978846, %v1014_v7  ;;  %v1015_v25 = vadd.f32 %v999_v3, %v2563_v24  ;;  %v1016_v26 = vadd.f32 %v1000_v4, %v2570_v44 }
 0x26e   : > { %v1072_v23 = vmul.f32 %v1056_v12, %v944_v32  ;;  %2096 = vtanh.f32 %v1029_v18  ;;  %v1073_v61 = vmul.f32 %v1057_v6, %v945_v46  ;;  %v1017_v0 = vadd.f32 %v1001_v58, %v2558_v17 }
 0x26f   : > { %1953 = vmatpush3.bf16.msra.mxu1 %v1092_v59  ;;  %v1074_v30 = vmul.f32 %v1058_v35, %v946_v16  ;;  %2098 = vtanh.f32 %v1030_v22  ;;  %v1031_v40 = vmul.f32 0.7978846, %v1015_v25  ;;  %v1032_v43 = vmul.f32 0.7978846, %v1016_v26  ;;  %v2053_v35 = vld [vmem:[%s2305_s30 + $0x18] sm:$0xff]   ;;  %v1099_v22 = vld [vmem:[%s2310_s15] sm:$0xff] }
 0x270   : > { %v1093_v34 = vpack.c.bf16 %v1072_v23, %v1071_v41  ;;  %v1018_v11 = vadd.f32 %v1002_v19, %v2567_v33  ;;  %v1033_v48 = vmul.f32 0.7978846, %v1017_v0  ;;  %v947_v54 = vmul.f32 0.5, %v2532_v42  ;;  %v2052_v41 = vld [vmem:[%s2305_s30 + $0x10] sm:$0xff]   ;;  %v1102_v26 = vld [vmem:[%s2310_s15 + $0x18] sm:$0xff] }
 0x271   : > { %v1094_v45 = vpack.c.bf16 %v1074_v30, %v1073_v61  ;;  %2100 = vtanh.f32 %v1031_v40  ;;  %v948_v55 = vmul.f32 0.5, %v2542_v52  ;;  %v949_v63 = vmul.f32 0.5, %v2528_v31  ;;  %v1100_v61 = vld [vmem:[%s2310_s15 + $0x8] sm:$0xff] }
 0x272   : > { %1954 = vmatprep.subr.bf16.mxu1 %v1093_v34  ;;  %2102 = vtanh.f32 %v1032_v43  ;;  %v1034_v50 = vmul.f32 0.7978846, %v1018_v11  ;;  %v950_v51 = vmul.f32 0.5, %v2537_v49  ;;  %v951_v5 = vmul.f32 0.5, %v2563_v24 }
 0x273   : > { %1955 = vmatpush3.bf16.msra.mxu1 %v1093_v34  ;;  %2104 = vtanh.f32 %v1033_v48  ;;  %v952_v4 = vmul.f32 0.5, %v2570_v44  ;;  %v953_v31 = vmul.f32 0.5, %v2558_v17  ;;  %v954_v12 = vmul.f32 0.5, %v2567_v33  ;;  %v2051_v17 = vld [vmem:[%s2305_s30 + $0x8] sm:$0xff]   ;;  %v1101_v33 = vld [vmem:[%s2310_s15 + $0x10] sm:$0xff] }
 0x274   : > { %v2093_v36 = vpop.eup %2092  ;;  %1956 = vmatprep.subr.bf16.mxu1 %v1094_v45  ;;  %2106 = vtanh.f32 %v1034_v50 }
 0x275   : > { %v2095_v27 = vpop.eup %2094  ;;  %v1059_v53 = vadd.f32 1.0, %v2093_v36 }
 0x276   : > { %v1060_v59 = vadd.f32 1.0, %v2095_v27  ;;  %v1105_v27 = vld [vmem:[%s2310_s15 + $0x30] sm:$0xff] }
 0x277   : > { %1957 = vmatpush3.bf16.msra.mxu1 %v1094_v45  ;;  %v1075_v60 = vmul.f32 %v1059_v53, %v947_v54  ;;  %v1103_v53 = vld [vmem:[%s2310_s15 + $0x20] sm:$0xff] }
 0x278   : > { %v2097_v29 = vpop.eup %2096  ;;  %v1076_v62 = vmul.f32 %v1060_v59, %v948_v55 }
 0x279   : > { %v2099_v32 = vpop.eup %2098  ;;  %v1061_v39 = vadd.f32 1.0, %v2097_v29  ;;  %v1104_v29 = vld [vmem:[%s2310_s15 + $0x28] sm:$0xff] }
 0x27a   : > { %v1095_v37 = vpack.c.bf16 %v1076_v62, %v1075_v60  ;;  %v1062_v46 = vadd.f32 1.0, %v2099_v32 }
 0x27b   : > { %v2101_v1 = vpop.eup %2100  ;;  %v1077_v2 = vmul.f32 %v1061_v39, %v949_v63 }
 0x27c   : > { %1958 = vmatprep.subr.bf16.mxu1 %v1095_v37  ;;  %v1078_v3 = vmul.f32 %v1062_v46, %v950_v51  ;;  %v2103_v42 = vpop.eup %2102  ;;  %v1063_v52 = vadd.f32 1.0, %v2101_v1 }
 0x27d   : > { %1959 = vmatpush3.bf16.msra.mxu1 %v1095_v37  ;;  %v2105_v47 = vpop.eup %2104  ;;  %v1064_v6 = vadd.f32 1.0, %v2103_v42 }
 0x27e   : > { %v1096_v56 = vpack.c.bf16 %v1078_v3, %v1077_v2  ;;  %v2107_v7 = vpop.eup %2106  ;;  %v1065_v49 = vadd.f32 1.0, %v2105_v47  ;;  %v1079_v57 = vmul.f32 %v1063_v52, %v951_v5 }
 0x27f   : > { %v1080_v58 = vmul.f32 %v1064_v6, %v952_v4  ;;  %v1066_v16 = vadd.f32 1.0, %v2107_v7 }
 0x280   : > { %1960 = vmatprep.subr.bf16.mxu1 %v1096_v56  ;;  %v1081_v18 = vmul.f32 %v1065_v49, %v953_v31 }
 0x281   : > { %1961 = vmatpush3.bf16.msra.mxu1 %v1096_v56  ;;  %v1097_v24 = vpack.c.bf16 %v1080_v58, %v1079_v57  ;;  %v1082_v44 = vmul.f32 %v1066_v16, %v954_v12 }
 0x283   : > { %1962 = vmatprep.subr.bf16.mxu1 %v1097_v24  ;;  %v1098_v19 = vpack.c.bf16 %v1082_v44, %v1081_v18 }
 0x285   : > { %1963 = vmatpush3.bf16.msra.mxu1 %v1097_v24 }
 0x286   : > { %1964 = vmatprep.subr.bf16.mxu1 %v1098_v19 }
 0x289   : > { %1965 = vmatpush3.bf16.msra.mxu1 %v1098_v19 }
 0x28c   : > { %1967 = vmatmul.mubr.bf16.vlgmr.msra.gmra.mrb[0].mxu1 %v2051_v17 }
 0x28d   : > { %1970 = vmatprep.mubr.bf16.mxu1 %v2052_v41 }
 0x294   : > { %1971 = vmatmul.mubr.bf16.gmra.mrb[4].mxu1 %v2053_v35 }
 0x35f   : > { %v1968_v23 = vpop.f32.mrb[0].mxu1 }
 0x360   : > { %v1165_v25 = vpop.f32.mrb[1].mxu1  ;;  %v1174_v30 = vadd.f32 %v1968_v23, %v1101_v33 }
 0x361   : > { %v1166_v34 = vadd.f32 %v1165_v25, %v1099_v22  ;;  %v1969_v40 = vpop.f32.mrb[2].mxu1 }
 0x362   : > { %v1168_v43 = vpop.f32.mrb[3].mxu1  ;;  %v1177_v45 = vadd.f32 %v1969_v40, %v1102_v26  ;;  %v2612_v48 = vadd.f32 %v1174_v30, %v2347_v9  ;;  %v1106_v9 = vld [vmem:[%s2310_s15 + $0x38] sm:$0xff] }
 0x363   : > { %v2609_v0 = vadd.f32 %v1166_v34, %v2345_v8  ;;  %v1169_v11 = vadd.f32 %v1168_v43, %v1100_v61 }
 0x364   : > { %v2622_v54 = vadd.f32 %v1177_v45, %v2355_v13  ;;  %v1210_v32 = vsel %vm607_vm1, %v2612_v48, 0.0 }
 0x365   : > { %v2615_v50 = vadd.f32 %v1169_v11, %v2349_v10  ;;  %v1204_v36 = vsel %vm607_vm1, %v2609_v0, 0.0 }
 0x366   : > { %1205 = vadd.xlane.f32.xlu0 %v1204_v36  ;;  %v1213_v51 = vsel %vm607_vm1, %v2622_v54, 0.0 }
 0x367   : > { %v1972_v55 = vpop.f32.mrb[4].mxu1  ;;  %v1207_v8 = vsel %vm607_vm1, %v2615_v50, 0.0 }
 0x368   : > { %v1181_v59 = vpop.f32.mrb[5].mxu1  ;;  %1208 = vadd.xlane.f32.xlu1 %v1207_v8  ;;  %v1190_v60 = vadd.f32 %v1972_v55, %v1105_v27 }
 0x369   : > { %v1182_v10 = vadd.f32 %v1181_v59, %v1103_v53  ;;  %v1973_v62 = vpop.f32.mrb[6].mxu1 }
 0x36a   : > { %v1184_v39 = vpop.f32.mrb[7].mxu1  ;;  %1211 = vadd.xlane.f32.xlu0 %v1210_v32  ;;  %v1193_v13 = vadd.f32 %v1973_v62, %v1106_v9  ;;  %v2636_v46 = vadd.f32 %v1190_v60, %v2369_v20 }
 0x36b   : > { %v2631_v37 = vadd.f32 %v1182_v10, %v2357_v14  ;;  %v1185_v63 = vadd.f32 %v1184_v39, %v1104_v29  ;;  %v2055_v29 = vld [vmem:[%s2320_s21 + $0x8] sm:$0xff]  }
 0x36c   : > { %1214 = vadd.xlane.f32.xlu1 %v1213_v51  ;;  %v2644_v14 = vadd.f32 %v1193_v13, %v2371_v21  ;;  %v1222_v42 = vsel %vm607_vm1, %v2636_v46, 0.0 }
 0x36d   : > { %v2639_v1 = vadd.f32 %v1185_v63, %v2359_v15  ;;  %v1216_v2 = vsel %vm607_vm1, %v2631_v37, 0.0  ;;  %v2054_v15 = vld [vmem:[%s2320_s21] sm:$0xff]  }
 0x36e   : > { %1217 = vadd.xlane.f32.xlu0 %v1216_v2  ;;  %v1225_v20 = vsel %vm607_vm1, %v2644_v14, 0.0  ;;  %1974 = vmatprep.subr.bf16.mxu0 %v2054_v15 }
 0x36f   : > { %v1219_v3 = vsel %vm607_vm1, %v2639_v1, 0.0  ;;  %1975 = vmatpush3.bf16.msra.mxu0 %v2054_v15 }
 0x370   : > { %1220 = vadd.xlane.f32.xlu1 %v1219_v3  ;;  %1976 = vmatprep.subr.bf16.mxu0 %v2055_v29 }
 0x372   : > { %1223 = vadd.xlane.f32.xlu0 %v1222_v42 }
 0x373   : > { %1977 = vmatpush3.bf16.msra.mxu0 %v2055_v29 }
 0x374   : > { %1226 = vadd.xlane.f32.xlu1 %v1225_v20 }
 0x3f3   : > { %v1206_v52 = vpop.xlane.xlu0 %1205 }
 0x3f4   : > { %v1228_v47 = vmul.f32 0.03125, %v1206_v52 }
 0x3f5   : > { %v1209_v56 = vpop.xlane.xlu1 %1208 }
 0x3f6   : > { %v2654_v21 = vsub.f32 %v2609_v0, %v1228_v47  ;;  %v1229_v5 = vmul.f32 0.03125, %v1209_v56 }
 0x3f7   : > { %v1212_v4 = vpop.xlane.xlu0 %1211 }
 0x3f8   : > { %v2657_v6 = vsub.f32 %v2615_v50, %v1229_v5  ;;  %v1230_v7 = vmul.f32 0.03125, %v1212_v4  ;;  %v1244_v31 = vmul.f32 %v2654_v21, %v2654_v21 }
 0x3f9   : > { %v1215_v49 = vpop.xlane.xlu1 %1214 }
 0x3fa   : > { %v2662_v57 = vsub.f32 %v2612_v48, %v1230_v7  ;;  %v1231_v58 = vmul.f32 0.03125, %v1215_v49  ;;  %v1252_v12 = vsel %vm607_vm1, %v1244_v31, 0.0  ;;  %v1245_v16 = vmul.f32 %v2657_v6, %v2657_v6 }
 0x3fb   : > { %1253 = vadd.xlane.f32.xlu0 %v1252_v12  ;;  %v1218_v24 = vpop.xlane.xlu0 %1217 }
 0x3fc   : > { %v2668_v18 = vsub.f32 %v2622_v54, %v1231_v58  ;;  %v1232_v44 = vmul.f32 0.03125, %v1218_v24  ;;  %v1255_v19 = vsel %vm607_vm1, %v1245_v16, 0.0  ;;  %v1246_v17 = vmul.f32 %v2662_v57, %v2662_v57 }
 0x3fd   : > { %1256 = vadd.xlane.f32.xlu1 %v1255_v19  ;;  %v1221_v41 = vpop.xlane.xlu1 %1220 }
 0x3fe   : > { %v2674_v35 = vsub.f32 %v2631_v37, %v1232_v44  ;;  %v1233_v33 = vmul.f32 0.03125, %v1221_v41  ;;  %v1258_v22 = vsel %vm607_vm1, %v1246_v17, 0.0  ;;  %v1247_v23 = vmul.f32 %v2668_v18, %v2668_v18 }
 0x3ff   : > { %1259 = vadd.xlane.f32.xlu0 %v1258_v22  ;;  %v1224_v25 = vpop.xlane.xlu0 %1223 }
 0x400   : > { %v2680_v26 = vsub.f32 %v2639_v1, %v1233_v33  ;;  %v1234_v61 = vmul.f32 0.03125, %v1224_v25  ;;  %v1261_v30 = vsel %vm607_vm1, %v1247_v23, 0.0  ;;  %v1248_v34 = vmul.f32 %v2674_v35, %v2674_v35 }
 0x401   : > { %1262 = vadd.xlane.f32.xlu1 %v1261_v30  ;;  %v1227_v40 = vpop.xlane.xlu1 %1226 }
 0x402   : > { %v2686_v43 = vsub.f32 %v2636_v46, %v1234_v61  ;;  %v1235_v45 = vmul.f32 0.03125, %v1227_v40  ;;  %v1264_v11 = vsel %vm607_vm1, %v1248_v34, 0.0  ;;  %v1249_v36 = vmul.f32 %v2680_v26, %v2680_v26 }
 0x403   : > { %1265 = vadd.xlane.f32.xlu0 %v1264_v11 }
 0x404   : > { %v2692_v27 = vsub.f32 %v2644_v14, %v1235_v45  ;;  %v1267_v53 = vsel %vm607_vm1, %v1249_v36, 0.0  ;;  %v1250_v55 = vmul.f32 %v2686_v43, %v2686_v43 }
 0x405   : > { %1268 = vadd.xlane.f32.xlu1 %v1267_v53 }
 0x406   : > { %v1270_v8 = vsel %vm607_vm1, %v1250_v55, 0.0  ;;  %v1251_v59 = vmul.f32 %v2692_v27, %v2692_v27 }
 0x407   : > { %1271 = vadd.xlane.f32.xlu0 %v1270_v8 }
 0x408   : > { %v1273_v9 = vsel %vm607_vm1, %v1251_v59, 0.0 }
 0x409   : > { %1274 = vadd.xlane.f32.xlu1 %v1273_v9 }
 0x488   : > { %v1254_v60 = vpop.xlane.xlu0 %1253 }
 0x489   : > { %v1276_v10 = vmul.f32 0.03125, %v1254_v60 }
 0x48a   : > { %v1257_v62 = vpop.xlane.xlu1 %1256 }
 0x48b   : > { %v1284_v32 = vadd.f32 1e-05, %v1276_v10  ;;  %v1277_v39 = vmul.f32 0.03125, %v1257_v62 }
 0x48c   : > { %v1260_v13 = vpop.xlane.xlu0 %1259 }
 0x48d   : > { %2108 = vrsqrt.f32 %v1284_v32  ;;  %v1285_v63 = vadd.f32 1e-05, %v1277_v39  ;;  %v1278_v51 = vmul.f32 0.03125, %v1260_v13 }
 0x48e   : > { %v1263_v2 = vpop.xlane.xlu1 %1262 }
 0x48f   : > { %2110 = vrsqrt.f32 %v1285_v63  ;;  %v1286_v3 = vadd.f32 1e-05, %v1278_v51  ;;  %v1279_v42 = vmul.f32 0.03125, %v1263_v2  ;;  %v2056_v63 = vld [vmem:[%s2325_s0] sm:$0xff]   ;;  %v2057_v51 = vld [vmem:[%s2325_s0 + $0x8] sm:$0xff]   ;;  %v2058_v2 = vld [vmem:[%s2325_s0 + $0x10] sm:$0xff]  }
 0x490   : > { %v1266_v20 = vpop.xlane.xlu0 %1265  ;;  %1986 = vmatprep.subr.bf16.mxu1 %v2056_v63 }
 0x491   : > { %2112 = vrsqrt.f32 %v1286_v3  ;;  %v1287_v15 = vadd.f32 1e-05, %v1279_v42  ;;  %v1280_v52 = vmul.f32 0.03125, %v1266_v20  ;;  %1987 = vmatpush3.bf16.msra.mxu1 %v2056_v63  ;;  %v2059_v3 = vld [vmem:[%s2325_s0 + $0x18] sm:$0xff]  }
 0x492   : > { %v1269_v47 = vpop.xlane.xlu1 %1268  ;;  %1988 = vmatprep.subr.bf16.mxu1 %v2057_v51 }
 0x493   : > { %2114 = vrsqrt.f32 %v1287_v15  ;;  %v1288_v56 = vadd.f32 1e-05, %v1280_v52  ;;  %v1281_v5 = vmul.f32 0.03125, %v1269_v47 }
 0x494   : > { %v1272_v4 = vpop.xlane.xlu0 %1271 }
 0x495   : > { %2116 = vrsqrt.f32 %v1288_v56  ;;  %v1289_v7 = vadd.f32 1e-05, %v1281_v5  ;;  %v1282_v31 = vmul.f32 0.03125, %v1272_v4  ;;  %1989 = vmatpush3.bf16.msra.mxu1 %v2057_v51 }
 0x496   : > { %v1275_v49 = vpop.xlane.xlu1 %1274  ;;  %1990 = vmatprep.subr.bf16.mxu1 %v2058_v2 }
 0x497   : > { %v2109_v58 = vpop.eup %2108  ;;  %2118 = vrsqrt.f32 %v1289_v7  ;;  %v1290_v12 = vadd.f32 1e-05, %v1282_v31  ;;  %v1283_v16 = vmul.f32 0.03125, %v1275_v49 }
 0x498   : > { %v1300_v24 = vmul.f32 %v2109_v58, %v2654_v21 }
 0x499   : > { %v2111_v44 = vpop.eup %2110  ;;  %2120 = vrsqrt.f32 %v1290_v12  ;;  %v1291_v19 = vadd.f32 1e-05, %v1283_v16  ;;  %1991 = vmatpush3.bf16.msra.mxu1 %v2058_v2 }
 0x49a   : > { %v1301_v17 = vmul.f32 %v2111_v44, %v2657_v6  ;;  %v1308_v41 = vmul.f32 %v2433_v38, %v1300_v24  ;;  %1992 = vmatprep.subr.bf16.mxu1 %v2059_v3 }
 0x49b   : > { %v2113_v33 = vpop.eup %2112  ;;  %2122 = vrsqrt.f32 %v1291_v19 }
 0x49c   : > { %v1302_v22 = vmul.f32 %v2113_v33, %v2662_v57  ;;  %v1309_v23 = vmul.f32 %v2433_v38, %v1301_v17  ;;  %v1316_v21 = vadd.f32 %v2442_v28, %v1308_v41 }
 0x49d   : > { %v2115_v25 = vpop.eup %2114  ;;  %1993 = vmatpush3.bf16.msra.mxu1 %v2059_v3 }
 0x49e   : > { %v1310_v61 = vmul.f32 %v2433_v38, %v1302_v22  ;;  %v1303_v30 = vmul.f32 %v2115_v25, %v2668_v18  ;;  %v1317_v34 = vadd.f32 %v2442_v28, %v1309_v23 }
 0x49f   : > { %v2117_v40 = vpop.eup %2116 }
 0x4a0   : > { %v1311_v6 = vmul.f32 %v2433_v38, %v1303_v30  ;;  %v1304_v45 = vmul.f32 %v2117_v40, %v2674_v35  ;;  %v1324_v11 = vpack.c.bf16 %v1317_v34, %v1316_v21  ;;  %v1318_v57 = vadd.f32 %v2442_v28, %v1310_v61 }
 0x4a1   : > { %v2119_v36 = vpop.eup %2118 }
 0x4a2   : > { %v1319_v53 = vadd.f32 %v2442_v28, %v1311_v6  ;;  %v1305_v55 = vmul.f32 %v2119_v36, %v2680_v26  ;;  %1978 = vmatprep.mubr.msk.bf16.mxu0 %vm607_vm1, %v1324_v11  ;;  %v1312_v18 = vmul.f32 %v2433_v38, %v1304_v45 }
 0x4a3   : > { %v2121_v8 = vpop.eup %2120 }
 0x4a4   : > { %v1306_v59 = vmul.f32 %v2121_v8, %v2686_v43  ;;  %v1325_v9 = vpack.c.bf16 %v1319_v53, %v1318_v57  ;;  %v1313_v29 = vmul.f32 %v2433_v38, %v1305_v55  ;;  %v1320_v26 = vadd.f32 %v2442_v28, %v1312_v18 }
 0x4a5   : > { %v2123_v35 = vpop.eup %2122 }
 0x4a6   : > { %v1307_v60 = vmul.f32 %v2123_v35, %v2692_v27  ;;  %1979 = vmatmul.mubr.msk.bf16.vlgmr.msra.gmra.mrb[16].mxu0 %vm607_vm1, %v1325_v9  ;;  %v1321_v10 = vadd.f32 %v2442_v28, %v1313_v29  ;;  %v1314_v62 = vmul.f32 %v2433_v38, %v1306_v59 }
 0x4a8   : > { %v1326_v32 = vpack.c.bf16 %v1321_v10, %v1320_v26  ;;  %v1315_v43 = vmul.f32 %v2433_v38, %v1307_v60  ;;  %v1322_v39 = vadd.f32 %v2442_v28, %v1314_v62  ;;  %v1862_v38 = vld [vmem:[%s561_s3] ss:$0 sm:$0xff] }
 0x4aa   : > { %1982 = vmatprep.mubr.msk.bf16.mxu0 %vm607_vm1, %v1326_v32  ;;  %v1323_v27 = vadd.f32 %v2442_v28, %v1315_v43 }
 0x4ac   : > { %v1327_v13 = vpack.c.bf16 %v1323_v27, %v1322_v39 }
 0x4ae   : > { %1983 = vmatmul.mubr.msk.bf16.gmra.mrb[20].mxu0 %vm607_vm1, %v1327_v13 }
 0x579   : > { %v1980_v28 = vpop.f32.mrb[16].mxu0 }
 0x57a   : > { %v2739_v42 = vadd.f32 %v1980_v28, %v1862_v38  ;;  %v1397_v20 = vpop.f32.mrb[17].mxu0 }
 0x57b   : > { %v2741_v15 = vadd.f32 %v1862_v38, %v1397_v20  ;;  %v1981_v52 = vpop.f32.mrb[18].mxu0 }
 0x57c   : > { %v1438_v47 = vmul.f32 0.044715, %v2739_v42  ;;  %v2744_v56 = vadd.f32 %v1981_v52, %v1862_v38  ;;  %v1400_v5 = vpop.f32.mrb[19].mxu0 }
 0x57d   : > { %v1436_v4 = vmul.f32 0.044715, %v2741_v15  ;;  %v2747_v7 = vadd.f32 %v1862_v38, %v1400_v5 }
 0x57e   : > { %v1446_v31 = vmul.f32 %v1438_v47, %v2739_v42  ;;  %v1439_v49 = vmul.f32 0.044715, %v2744_v56 }
 0x57f   : > { %v1444_v58 = vmul.f32 %v1436_v4, %v2741_v15  ;;  %v1437_v12 = vmul.f32 0.044715, %v2747_v7 }
 0x580   : > { %v1454_v16 = vmul.f32 %v1446_v31, %v2739_v42  ;;  %v1447_v24 = vmul.f32 %v1439_v49, %v2744_v56  ;;  %v1430_v31 = vmul.f32 0.5, %v2739_v42  ;;  %v1431_v49 = vmul.f32 0.5, %v2744_v56 }
 0x581   : > { %v1452_v44 = vmul.f32 %v1444_v58, %v2741_v15  ;;  %v1445_v19 = vmul.f32 %v1437_v12, %v2747_v7  ;;  %v1984_v17 = vpop.f32.mrb[20].mxu0  ;;  %v1428_v12 = vmul.f32 0.5, %v2741_v15 }
 0x582   : > { %v1462_v41 = vadd.f32 %v1454_v16, %v2739_v42  ;;  %v1455_v33 = vmul.f32 %v1447_v24, %v2744_v56  ;;  %v2759_v22 = vadd.f32 %v1984_v17, %v1862_v38  ;;  %v1413_v23 = vpop.f32.mrb[21].mxu0  ;;  %v1429_v16 = vmul.f32 0.5, %v2747_v7 }
 0x583   : > { %v1460_v25 = vadd.f32 %v1452_v44, %v2741_v15  ;;  %v1453_v61 = vmul.f32 %v1445_v19, %v2747_v7  ;;  %v2763_v30 = vadd.f32 %v1862_v38, %v1413_v23  ;;  %v1985_v21 = vpop.f32.mrb[22].mxu0 }
 0x584   : > { %v1470_v34 = vmul.f32 0.7978846, %v1462_v41  ;;  %v1463_v40 = vadd.f32 %v1455_v33, %v2744_v56  ;;  %v1442_v6 = vmul.f32 0.044715, %v2759_v22  ;;  %v1425_v45 = vadd.f32 %v1985_v21, %v1862_v38  ;;  %v1416_v11 = vpop.f32.mrb[23].mxu0 }
 0x585   : > { %v1468_v36 = vmul.f32 0.7978846, %v1460_v25  ;;  %v1461_v57 = vadd.f32 %v1453_v61, %v2747_v7  ;;  %v1440_v53 = vmul.f32 0.044715, %v2763_v30  ;;  %v1417_v55 = vadd.f32 %v1862_v38, %v1416_v11 }
 0x586   : > { %2124 = vtanh.f32 %v1470_v34  ;;  %v1471_v18 = vmul.f32 0.7978846, %v1463_v40  ;;  %v1450_v8 = vmul.f32 %v1442_v6, %v2759_v22  ;;  %v1443_v59 = vmul.f32 0.044715, %v1425_v45 }
 0x587   : > { %2126 = vtanh.f32 %v1468_v36  ;;  %v1469_v9 = vmul.f32 0.7978846, %v1461_v57  ;;  %v1448_v29 = vmul.f32 %v1440_v53, %v2763_v30  ;;  %v1441_v35 = vmul.f32 0.044715, %v1417_v55 }
 0x588   : > { %2128 = vtanh.f32 %v1471_v18  ;;  %v1458_v60 = vmul.f32 %v1450_v8, %v2759_v22  ;;  %v1451_v26 = vmul.f32 %v1443_v59, %v1425_v45  ;;  %v1434_v15 = vmul.f32 0.5, %v2759_v22 }
 0x589   : > { %2130 = vtanh.f32 %v1469_v9  ;;  %v1456_v10 = vmul.f32 %v1448_v29, %v2763_v30  ;;  %v1449_v62 = vmul.f32 %v1441_v35, %v1417_v55  ;;  %v1435_v7 = vmul.f32 0.5, %v1425_v45 }
 0x58a   : > { %v1466_v32 = vadd.f32 %v1458_v60, %v2759_v22  ;;  %v1459_v43 = vmul.f32 %v1451_v26, %v1425_v45  ;;  %v1432_v6 = vmul.f32 0.5, %v2763_v30  ;;  %v1433_v11 = vmul.f32 0.5, %v1417_v55  ;;  %v1869_v22 = vld [vmem:[%s569_s16] ss:$0 sm:$0xff] }
 0x58b   : > { %v1464_v39 = vadd.f32 %v1456_v10, %v2763_v30  ;;  %v1457_v27 = vmul.f32 %v1449_v62, %v1417_v55 }
 0x58c   : > { %v1474_v13 = vmul.f32 0.7978846, %v1466_v32  ;;  %v1467_v63 = vadd.f32 %v1459_v43, %v1425_v45 }
 0x58d   : > { %v1472_v51 = vmul.f32 0.7978846, %v1464_v39  ;;  %v1465_v2 = vadd.f32 %v1457_v27, %v1417_v55 }
 0x58e   : > { %2132 = vtanh.f32 %v1474_v13  ;;  %v1475_v3 = vmul.f32 0.7978846, %v1467_v63 }
 0x58f   : > { %2134 = vtanh.f32 %v1472_v51  ;;  %v1473_v38 = vmul.f32 0.7978846, %v1465_v2 }
 0x590   : > { %v2125_v28 = vpop.eup %2124  ;;  %2136 = vtanh.f32 %v1475_v3 }
 0x591   : > { %v2127_v20 = vpop.eup %2126  ;;  %v1486_v52 = vadd.f32 1.0, %v2125_v28  ;;  %2138 = vtanh.f32 %v1473_v38 }
 0x592   : > { %v2129_v47 = vpop.eup %2128  ;;  %v1484_v5 = vadd.f32 1.0, %v2127_v20 }
 0x593   : > { %v2131_v4 = vpop.eup %2130  ;;  %v1487_v58 = vadd.f32 1.0, %v2129_v47  ;;  %v1494_v44 = vmul.f32 %v1486_v52, %v1430_v31 }
 0x594   : > { %v1485_v24 = vadd.f32 1.0, %v2131_v4  ;;  %v1492_v17 = vmul.f32 %v1484_v5, %v1428_v12 }
 0x595   : > { %v1495_v19 = vmul.f32 %v1487_v58, %v1431_v49 }
 0x596   : > { %v1493_v41 = vmul.f32 %v1485_v24, %v1429_v16 }
 0x597   : > { %v1501_v33 = vpack.c.bf16 %v1495_v19, %v1494_v44 }
 0x598   : > { %v2133_v23 = vpop.eup %2132  ;;  %v1500_v25 = vpack.c.bf16 %v1493_v41, %v1492_v17 }
 0x599   : > { %v2135_v61 = vpop.eup %2134  ;;  %v1490_v21 = vadd.f32 1.0, %v2133_v23 }
 0x59a   : > { %v2137_v34 = vpop.eup %2136  ;;  %1994 = vmatprep.mubr.msk.bf16.mxu1 %vm817_vm2, %v1500_v25  ;;  %v1488_v42 = vadd.f32 1.0, %v2135_v61 }
 0x59b   : > { %v2139_v56 = vpop.eup %2138  ;;  %1995 = vmatmul.mubr.msk.bf16.vlgmr.msra.gmra.mrb[8].mxu1 %vm817_vm2, %v1501_v33  ;;  %v1491_v40 = vadd.f32 1.0, %v2137_v34  ;;  %v1498_v57 = vmul.f32 %v1490_v21, %v1434_v15 }
 0x59c   : > { %v1489_v36 = vadd.f32 1.0, %v2139_v56  ;;  %v1496_v18 = vmul.f32 %v1488_v42, %v1432_v6 }
 0x59d   : > { %v1499_v53 = vmul.f32 %v1491_v40, %v1435_v7 }
 0x59e   : > { %v1497_v8 = vmul.f32 %v1489_v36, %v1433_v11 }
 0x59f   : > { %v1503_v59 = vpack.c.bf16 %v1499_v53, %v1498_v57 }
 0x5a0   : > { %v1502_v9 = vpack.c.bf16 %v1497_v8, %v1496_v18 }
 0x5a2   : > { %1998 = vmatprep.mubr.msk.bf16.mxu1 %vm817_vm2, %v1502_v9 }
 0x5a3   : > { %1999 = vmatmul.mubr.msk.bf16.gmra.mrb[12].mxu1 %vm817_vm2, %v1503_v59 }
 0x66e   : > { %v1996_v30 = vpop.f32.mrb[8].mxu1 }
 0x66f   : > { %v1598_v45 = vadd.f32 %v1996_v30, %v1869_v22  ;;  %v1589_v55 = vpop.f32.mrb[9].mxu1 }
 0x670   : > { %v1590_v29 = vadd.f32 %v1869_v22, %v1589_v55  ;;  %v1997_v35 = vpop.f32.mrb[10].mxu1 }
 0x671   : > { %v1622_v60 = vadd.f32 %v1598_v45, %v2612_v48  ;;  %v1601_v26 = vadd.f32 %v1997_v35, %v1869_v22  ;;  %v1592_v10 = vpop.f32.mrb[11].mxu1 }
 0x672   : > { %v1620_v62 = vadd.f32 %v1590_v29, %v2609_v0  ;;  %v1593_v32 = vadd.f32 %v1869_v22, %v1592_v10 }
 0x673   : > { %1630 = vst.msk [vmem:[#allocation2 + $0x10] sm:$0xff] %vm607_vm1, %v1622_v60  ;;  %1638 = vst.msk [vmem:[%s2334_s6 + $0x10] sm:$0xff] %vm607_vm1, %v1622_v60  ;;  %v1623_v43 = vadd.f32 %v1601_v26, %v2622_v54 }
 0x674   : > { %1628 = vst.msk [vmem:[#allocation2] sm:$0xff] %vm607_vm1, %v1620_v62  ;;  %1636 = vst.msk [vmem:[%s2334_s6] sm:$0xff] %vm607_vm1, %v1620_v62  ;;  %v1621_v39 = vadd.f32 %v1593_v32, %v2615_v50 }
 0x675   : > { %1631 = vst.msk [vmem:[#allocation2 + $0x18] sm:$0xff] %vm607_vm1, %v1623_v43  ;;  %1639 = vst.msk [vmem:[%s2334_s6 + $0x18] sm:$0xff] %vm607_vm1, %v1623_v43 }
 0x676   : > { %1629 = vst.msk [vmem:[#allocation2 + $0x8] sm:$0xff] %vm607_vm1, %v1621_v39  ;;  %1637 = vst.msk [vmem:[%s2334_s6 + $0x8] sm:$0xff] %vm607_vm1, %v1621_v39  ;;  %v2000_v0 = vpop.f32.mrb[12].mxu1 }
 0x677   : > { %v1614_v48 = vadd.f32 %v2000_v0, %v1869_v22  ;;  %v1605_v54 = vpop.f32.mrb[13].mxu1 }
 0x678   : > { %v1606_v27 = vadd.f32 %v1869_v22, %v1605_v54  ;;  %v2001_v13 = vpop.f32.mrb[14].mxu1 }
 0x679   : > { %v1626_v63 = vadd.f32 %v1614_v48, %v2636_v46  ;;  %v1617_v50 = vadd.f32 %v2001_v13, %v1869_v22  ;;  %v1608_v51 = vpop.f32.mrb[15].mxu1 }
 0x67a   : > { %v1624_v2 = vadd.f32 %v1606_v27, %v2631_v37  ;;  %v1609_v3 = vadd.f32 %v1869_v22, %v1608_v51 }
 0x67b   : > { %1634 = vst.msk [vmem:[#allocation2 + $0x30] sm:$0xff] %vm607_vm1, %v1626_v63  ;;  %1642 = vst.msk [vmem:[%s2334_s6 + $0x30] sm:$0xff] %vm607_vm1, %v1626_v63  ;;  %v1627_v38 = vadd.f32 %v1617_v50, %v2644_v14 }
 0x67c   : > { %1632 = vst.msk [vmem:[#allocation2 + $0x20] sm:$0xff] %vm607_vm1, %v1624_v2  ;;  %1640 = vst.msk [vmem:[%s2334_s6 + $0x20] sm:$0xff] %vm607_vm1, %v1624_v2  ;;  %v1625_v28 = vadd.f32 %v1609_v3, %v2639_v1 }
 0x67d   : > { %1635 = vst.msk [vmem:[#allocation2 + $0x38] sm:$0xff] %vm607_vm1, %v1627_v38  ;;  %1643 = vst.msk [vmem:[%s2334_s6 + $0x38] sm:$0xff] %vm607_vm1, %v1627_v38 }
 0x67e   : > { %1633 = vst.msk [vmem:[#allocation2 + $0x28] sm:$0xff] %vm607_vm1, %v1625_v28  ;;  %1641 = vst.msk [vmem:[%s2334_s6 + $0x28] sm:$0xff] %vm607_vm1, %v1625_v28 }
 0x67f PF: > { %s2872_s24 = sld [smem:[#allocation5_spill]]  ;;  %s2873_s17 = sld [smem:[#allocation3_spill]] }
 0x680   : > { %s2874_s18 = sld [smem:[#allocation4_spill]]  ;;  %s2875_s19 = sld [smem:[#allocation6_spill]] }
 0x681   : > { %s2876_s20 = sld [smem:[#allocation7_spill]] }
 0x685   : > { %s21_s21 = sadd.s32 1, %s2872_s24  }
 0x686   : > { %p18_p8 = scmp.ge.s32.totalorder %s21_s21, 6  }
 0x688   :  { %20 = sbr.rel (!%p18_p8) target bundleno = 7 (0x7), region = 128 }

</bundles_post_ra>
